<compile_context>
chip_gen: v5e
topology: v5e:2x2
jax: 0.10.0
libtpu: 0.0.40
codegen_flags: <defaults>
</compile_context>

<pallas_src>
import jax
import jax.numpy as jnp
from jax.experimental import pallas as pl
from jax.experimental.pallas import tpu as pltpu

# ----------------------------- small BERT config -----------------------------
VOCAB = 128          # vocab size
HIDDEN = 32          # hidden size
N_LAYERS = 2
N_HEADS = 2
HEAD_DIM = HIDDEN // N_HEADS
INTERMEDIATE = 64
MAX_POS = 16
TYPE_VOCAB = 2
NUM_LABELS = 2
LN_EPS = 1e-12

BATCH = 2
SEQ = 8


def _full_spec(shape):
    """Whole-array VMEM block (everything here fits VMEM with huge headroom)."""
    zero = (0,) * len(shape)
    return pl.BlockSpec(tuple(shape), lambda i: zero)


# ------------------------- fused forward-pass kernel -------------------------
def _discriminator_kernel(ids_ref, tt_ref, mask_ref, labels_ref,
                          wemb_ref, pemb_ref, temb_ref, elng_ref, elnb_ref,
                          wqkv_ref, bqkv_ref, wo_ref, bo_ref, ln1g_ref, ln1b_ref,
                          wi_ref, bi_ref, wo2_ref, bo2_ref, ln2g_ref, ln2b_ref,
                          poolw_ref, poolb_ref, clsw_ref, clsb_ref,
                          loss_ref):
    f32 = jnp.float32
    bf16 = jnp.bfloat16

    B, S = mask_ref.shape
    BS = B * S
    V, H = wemb_ref.shape
    L = wqkv_ref.shape[0]
    n_heads = N_HEADS
    head_dim = H // n_heads
    n_labels = clsw_ref.shape[1]
    type_vocab = temb_ref.shape[0]
    scale = 1.0 / float(head_dim) ** 0.5

    def bdot(a, b):
        # bf16 operands on the MXU, f32 accumulation (safe on v5e/v6e/v7x).
        return jnp.dot(a.astype(bf16), b.astype(bf16), preferred_element_type=f32)

    def layer_norm(x, g, b):
        # Residual add happens at the call sites (fused into the same VPU pass).
        mu = jnp.mean(x, axis=-1, keepdims=True)
        var = jnp.mean((x - mu) * (x - mu), axis=-1, keepdims=True)
        return (x - mu) * jax.lax.rsqrt(var + LN_EPS) * g + b

    # -------------------- embeddings (word lookup as in-kernel one-hot matmul) ----------
    # TODO(synk): at a realistic 30k vocab replace this with an SMEM scalar-prefetch
    #             gather; at VOCAB=128 the one-hot contraction is a single vreg on the MXU.
    ids = ids_ref[...]                                                       # (BS, 1) int32
    word_oh = (ids == jax.lax.broadcasted_iota(jnp.int32, (BS, V), 1)).astype(f32)
    word = bdot(word_oh, wemb_ref[...])                                      # (BS, H) f32

    pos_tab = pemb_ref[...].astype(f32)                                      # (MAX_POS, H)
    pos = jnp.concatenate([pos_tab[0:S, :]] * B, axis=0)                     # (BS, H)

    tt = tt_ref[...]                                                         # (BS, 1) int32
    type_tab = temb_ref[...].astype(f32)                                     # (TYPE_VOCAB, H)
    tok = jnp.zeros((BS, H), f32)
    for t in range(type_vocab):
        tok = tok + jnp.where(tt == t, type_tab[t:t + 1, :], 0.0)

    x = layer_norm(word + pos + tok, elng_ref[...], elnb_ref[...])           # (BS, H) f32

    # -------------------- encoder layers (fused QKV, all heads in this step) ------------
    neg_bias = (1.0 - mask_ref[...]) * -1e9                                  # (B, S) f32
    for l in range(L):
        qkv = bdot(x, wqkv_ref[l]) + bqkv_ref[l]                             # (BS, 3H)
        ctx_rows = []
        for b in range(B):
            r0 = b * S
            bias = neg_bias[b:b + 1, :]                                      # (1, S)
            heads = []
            for h in range(n_heads):
                c0 = h * head_dim
                q = qkv[r0:r0 + S, c0:c0 + head_dim]
                k = qkv[r0:r0 + S, H + c0:H + c0 + head_dim]
                v = qkv[r0:r0 + S, 2 * H + c0:2 * H + c0 + head_dim]
                s = jax.lax.dot_general(q.astype(bf16), k.astype(bf16),
                                        (((1,), (1,)), ((), ())),
                                        preferred_element_type=f32) * scale + bias
                s = s - jnp.max(s, axis=-1, keepdims=True)
                p = jnp.exp(s)
                p = p / jnp.sum(p, axis=-1, keepdims=True)
                heads.append(bdot(p, v))                                     # (S, head_dim)
            ctx_rows.append(jnp.concatenate(heads, axis=-1))                 # (S, H)
        ctx = jnp.concatenate(ctx_rows, axis=0)                              # (BS, H)

        attn_out = bdot(ctx, wo_ref[l]) + bo_ref[l]
        x = layer_norm(attn_out + x, ln1g_ref[l], ln1b_ref[l])               # residual fused

        inter = bdot(x, wi_ref[l]) + bi_ref[l]                               # (BS, I)
        inter = 0.5 * inter * (1.0 + jax.lax.erf(inter * 0.7071067811865475))  # exact GELU
        ffn = bdot(inter, wo2_ref[l]) + bo2_ref[l]
        x = layer_norm(ffn + x, ln2g_ref[l], ln2b_ref[l])                    # residual fused

    # -------------------- pooler + classifier + CrossEntropyLoss (mean NLL) -------------
    cls_tok = jnp.concatenate([x[b * S:b * S + 1, :] for b in range(B)], axis=0)   # (B, H)
    pooled = jnp.tanh(bdot(cls_tok, poolw_ref[...]) + poolb_ref[...])        # (B, H)
    logits = bdot(pooled, clsw_ref[...]) + clsb_ref[...]                     # (B, C)

    onehot = (labels_ref[...] ==
              jax.lax.broadcasted_iota(jnp.int32, (B, n_labels), 1)).astype(f32)
    z = logits - jnp.max(logits, axis=-1, keepdims=True)
    logp = z - jnp.log(jnp.sum(jnp.exp(z), axis=-1, keepdims=True))
    nll = -jnp.sum(onehot * logp, axis=-1, keepdims=True)                    # (B, 1)
    loss_ref[...] = jnp.sum(nll, axis=0, keepdims=True) / float(B)           # (1, 1)


# ------------------------------ parameter init --------------------------------
def init_params(key):
    keys = iter(jax.random.split(key, 16))

    def normal(shape):
        # Weights stored in bf16 (MXU-native on v6e/v7x; halves DMA + VMEM bytes).
        return (0.02 * jax.random.normal(next(keys), shape, jnp.float32)).astype(jnp.bfloat16)

    def zeros(shape):
        return jnp.zeros(shape, jnp.float32)

    def ones(shape):
        return jnp.ones(shape, jnp.float32)

    L = N_LAYERS
    return {
        "word_emb": normal((VOCAB, HIDDEN)),
        "pos_emb": normal((MAX_POS, HIDDEN)),
        "type_emb": normal((TYPE_VOCAB, HIDDEN)),
        "emb_ln_g": ones((1, HIDDEN)),
        "emb_ln_b": zeros((1, HIDDEN)),
        # Fused QKV weight/bias per layer, stacked over layers.
        "wqkv": normal((L, HIDDEN, 3 * HIDDEN)),
        "bqkv": zeros((L, 1, 3 * HIDDEN)),
        "wo": normal((L, HIDDEN, HIDDEN)),
        "bo": zeros((L, 1, HIDDEN)),
        "ln1_g": ones((L, 1, HIDDEN)),
        "ln1_b": zeros((L, 1, HIDDEN)),
        "wi": normal((L, HIDDEN, INTERMEDIATE)),
        "bi": zeros((L, 1, INTERMEDIATE)),
        "wo2": normal((L, INTERMEDIATE, HIDDEN)),
        "bo2": zeros((L, 1, HIDDEN)),
        "ln2_g": ones((L, 1, HIDDEN)),
        "ln2_b": zeros((L, 1, HIDDEN)),
        "pooler_w": normal((HIDDEN, HIDDEN)),
        "pooler_b": zeros((1, HIDDEN)),
        "cls_w": normal((HIDDEN, NUM_LABELS)),
        "cls_b": zeros((1, NUM_LABELS)),
    }


# ------------------------------ model forward ---------------------------------
def discriminator_forward(params, input_ids, attention_mask, token_type_ids, labels):
    """Equivalent of Discriminator.forward(...) -> scalar classification loss.

    Single fused pallas_call: all weights + activations stay resident in VMEM.
    """
    B, S = input_ids.shape
    ids_col = input_ids.reshape(B * S, 1).astype(jnp.int32)
    tt_col = token_type_ids.reshape(B * S, 1).astype(jnp.int32)
    mask_f = attention_mask.astype(jnp.float32)                  # (B, S)
    labels_col = labels.reshape(B, 1).astype(jnp.int32)

    operands = [
        ids_col, tt_col, mask_f, labels_col,
        params["word_emb"], params["pos_emb"], params["type_emb"],
        params["emb_ln_g"], params["emb_ln_b"],
        params["wqkv"], params["bqkv"], params["wo"], params["bo"],
        params["ln1_g"], params["ln1_b"],
        params["wi"], params["bi"], params["wo2"], params["bo2"],
        params["ln2_g"], params["ln2_b"],
        params["pooler_w"], params["pooler_b"], params["cls_w"], params["cls_b"],
    ]
    in_specs = [_full_spec(op.shape) for op in operands]

    loss = pl.pallas_call(
        _discriminator_kernel,
        out_shape=jax.ShapeDtypeStruct((1, 1), jnp.float32),
        grid=(1,),
        in_specs=in_specs,
        out_specs=pl.BlockSpec((1, 1), lambda i: (0, 0)),
        compiler_params=pltpu.CompilerParams(dimension_semantics=("arbitrary",)),
    )(*operands)
    return loss[0, 0]


# -------------------- apply_word_embeddings (separate module method) ----------------
def _word_emb_kernel(p_ref, w_ref, o_ref):
    o_ref[...] = jnp.dot(p_ref[...].astype(jnp.bfloat16), w_ref[...],
                         preferred_element_type=jnp.float32)


def apply_word_embeddings(params, inputs):
    """Equivalent of Discriminator.apply_word_embeddings: (B, S, V) @ (V, H) -> (B, S, H)."""
    B, S, V = inputs.shape
    H = params["word_emb"].shape[1]
    flat = inputs.reshape(B * S, V).astype(jnp.float32)
    # At toy sizes one full-resident block is optimal; for real shapes tile B*S with a
    # grid so the BlockSpec pipeline overlaps DMA with compute.
    out = pl.pallas_call(
        _word_emb_kernel,
        out_shape=jax.ShapeDtypeStruct((B * S, H), jnp.float32),
        grid=(1,),
        in_specs=[_full_spec((B * S, V)), _full_spec((V, H))],
        out_specs=pl.BlockSpec((B * S, H), lambda i: (0, 0)),
        compiler_params=pltpu.CompilerParams(dimension_semantics=("arbitrary",)),
    )(flat, params["word_emb"])
    return out.reshape(B, S, H)


# ------------------------------------ main -------------------------------------
if __name__ == "__main__":
    root = jax.random.PRNGKey(0)
    k_param, k_ids, k_lbl, k_gumbel = jax.random.split(root, 4)

    params = init_params(k_param)

    input_ids = jax.random.randint(k_ids, (BATCH, SEQ), 0, VOCAB, dtype=jnp.int32)
    attention_mask = jnp.array([[1] * SEQ, [1] * (SEQ - 2) + [0] * 2], dtype=jnp.int32)
    token_type_ids = jnp.zeros((BATCH, SEQ), dtype=jnp.int32)
    labels = jax.random.randint(k_lbl, (BATCH,), 0, NUM_LABELS, dtype=jnp.int32)

    fwd = jax.jit(discriminator_forward)
    loss = fwd(params, input_ids, attention_mask, token_type_ids, labels)
    loss = jax.block_until_ready(loss)

    # apply_word_embeddings with gumbel-softmax-like relaxed one-hot inputs.
    gumbel_probs = jax.nn.softmax(
        jax.random.normal(k_gumbel, (BATCH, SEQ, VOCAB), jnp.float32), axis=-1)
    emb = jax.jit(apply_word_embeddings)(params, gumbel_probs)
    emb = jax.block_until_ready(emb)

    assert loss.shape == () and jnp.isfinite(loss)
    assert emb.shape == (BATCH, SEQ, HIDDEN)
    print("KERNEL_OK")
</pallas_src>

<mosaic_0001>
module attributes {stable_mosaic.version = 11 : i64} {
  func.func @_discriminator_kernel(%arg0: i32, %arg1: memref<16x1xi32, #tpu.memory_space<vmem>>, %arg2: memref<16x1xi32, #tpu.memory_space<vmem>>, %arg3: memref<2x8xf32, #tpu.memory_space<vmem>>, %arg4: memref<2x1xi32, #tpu.memory_space<vmem>>, %arg5: memref<128x32xbf16, #tpu.memory_space<vmem>>, %arg6: memref<16x32xbf16, #tpu.memory_space<vmem>>, %arg7: memref<2x32xbf16, #tpu.memory_space<vmem>>, %arg8: memref<1x32xf32, #tpu.memory_space<vmem>>, %arg9: memref<1x32xf32, #tpu.memory_space<vmem>>, %arg10: memref<2x32x96xbf16, #tpu.memory_space<vmem>>, %arg11: memref<2x1x96xf32, #tpu.memory_space<vmem>>, %arg12: memref<2x32x32xbf16, #tpu.memory_space<vmem>>, %arg13: memref<2x1x32xf32, #tpu.memory_space<vmem>>, %arg14: memref<2x1x32xf32, #tpu.memory_space<vmem>>, %arg15: memref<2x1x32xf32, #tpu.memory_space<vmem>>, %arg16: memref<2x32x64xbf16, #tpu.memory_space<vmem>>, %arg17: memref<2x1x64xf32, #tpu.memory_space<vmem>>, %arg18: memref<2x64x32xbf16, #tpu.memory_space<vmem>>, %arg19: memref<2x1x32xf32, #tpu.memory_space<vmem>>, %arg20: memref<2x1x32xf32, #tpu.memory_space<vmem>>, %arg21: memref<2x1x32xf32, #tpu.memory_space<vmem>>, %arg22: memref<32x32xbf16, #tpu.memory_space<vmem>>, %arg23: memref<1x32xf32, #tpu.memory_space<vmem>>, %arg24: memref<32x2xbf16, #tpu.memory_space<vmem>>, %arg25: memref<1x2xf32, #tpu.memory_space<vmem>>, %arg26: memref<1x1xf32, #tpu.memory_space<vmem>>) attributes {dimension_semantics = [#tpu.dimension_semantics<arbitrary>], iteration_bounds = array<i64: 1>, scalar_prefetch = 0 : i64, scratch_operands = 0 : i64, tpu.core_type = #tpu.core_type<tc>, window_params = [{pipeline_mode = #tpu.pipeline_mode<synchronous>, transform_indices = @transform_0, window_bounds = array<i64: 16, 1>}, {pipeline_mode = #tpu.pipeline_mode<synchronous>, transform_indices = @transform_1, window_bounds = array<i64: 16, 1>}, {pipeline_mode = #tpu.pipeline_mode<synchronous>, transform_indices = @transform_2, window_bounds = array<i64: 2, 8>}, {pipeline_mode = #tpu.pipeline_mode<synchronous>, transform_indices = @transform_3, window_bounds = array<i64: 2, 1>}, {pipeline_mode = #tpu.pipeline_mode<synchronous>, transform_indices = @transform_4, window_bounds = array<i64: 128, 32>}, {pipeline_mode = #tpu.pipeline_mode<synchronous>, transform_indices = @transform_5, window_bounds = array<i64: 16, 32>}, {pipeline_mode = #tpu.pipeline_mode<synchronous>, transform_indices = @transform_6, window_bounds = array<i64: 2, 32>}, {pipeline_mode = #tpu.pipeline_mode<synchronous>, transform_indices = @transform_7, window_bounds = array<i64: 1, 32>}, {pipeline_mode = #tpu.pipeline_mode<synchronous>, transform_indices = @transform_8, window_bounds = array<i64: 1, 32>}, {pipeline_mode = #tpu.pipeline_mode<synchronous>, transform_indices = @transform_9, window_bounds = array<i64: 2, 32, 96>}, {pipeline_mode = #tpu.pipeline_mode<synchronous>, transform_indices = @transform_10, window_bounds = array<i64: 2, 1, 96>}, {pipeline_mode = #tpu.pipeline_mode<synchronous>, transform_indices = @transform_11, window_bounds = array<i64: 2, 32, 32>}, {pipeline_mode = #tpu.pipeline_mode<synchronous>, transform_indices = @transform_12, window_bounds = array<i64: 2, 1, 32>}, {pipeline_mode = #tpu.pipeline_mode<synchronous>, transform_indices = @transform_13, window_bounds = array<i64: 2, 1, 32>}, {pipeline_mode = #tpu.pipeline_mode<synchronous>, transform_indices = @transform_14, window_bounds = array<i64: 2, 1, 32>}, {pipeline_mode = #tpu.pipeline_mode<synchronous>, transform_indices = @transform_15, window_bounds = array<i64: 2, 32, 64>}, {pipeline_mode = #tpu.pipeline_mode<synchronous>, transform_indices = @transform_16, window_bounds = array<i64: 2, 1, 64>}, {pipeline_mode = #tpu.pipeline_mode<synchronous>, transform_indices = @transform_17, window_bounds = array<i64: 2, 64, 32>}, {pipeline_mode = #tpu.pipeline_mode<synchronous>, transform_indices = @transform_18, window_bounds = array<i64: 2, 1, 32>}, {pipeline_mode = #tpu.pipeline_mode<synchronous>, transform_indices = @transform_19, window_bounds = array<i64: 2, 1, 32>}, {pipeline_mode = #tpu.pipeline_mode<synchronous>, transform_indices = @transform_20, window_bounds = array<i64: 2, 1, 32>}, {pipeline_mode = #tpu.pipeline_mode<synchronous>, transform_indices = @transform_21, window_bounds = array<i64: 32, 32>}, {pipeline_mode = #tpu.pipeline_mode<synchronous>, transform_indices = @transform_22, window_bounds = array<i64: 1, 32>}, {pipeline_mode = #tpu.pipeline_mode<synchronous>, transform_indices = @transform_23, window_bounds = array<i64: 32, 2>}, {pipeline_mode = #tpu.pipeline_mode<synchronous>, transform_indices = @transform_24, window_bounds = array<i64: 1, 2>}, {pipeline_mode = #tpu.pipeline_mode<synchronous>, transform_indices = @transform_25, window_bounds = array<i64: 1, 1>}]} {
    %c0 = arith.constant 0 : index
    %c0_0 = arith.constant 0 : index
    %0 = vector.load %arg1[%c0, %c0_0] : memref<16x1xi32, #tpu.memory_space<vmem>>, vector<16x1xi32>
    %1 = tpu.iota {dimensions = array<i32: 1>} : vector<16x128xi32>
    %2 = vector.broadcast %0 : vector<16x1xi32> to vector<16x128xi32>
    %3 = arith.cmpi eq, %2, %1 : vector<16x128xi32>
    %4 = arith.extui %3 : vector<16x128xi1> to vector<16x128xi32>
    %5 = arith.sitofp %4 : vector<16x128xi32> to vector<16x128xf32>
    %c0_1 = arith.constant 0 : index
    %c0_2 = arith.constant 0 : index
    %6 = vector.load %arg5[%c0_1, %c0_2] : memref<128x32xbf16, #tpu.memory_space<vmem>>, vector<128x32xbf16>
    %7 = arith.truncf %5 : vector<16x128xf32> to vector<16x128xbf16>
    %cst = arith.constant dense<0.000000e+00> : vector<16x32xf32>
    %8 = tpu.matmul %7, %6, %cst {dimension_numbers = #tpu.dot_dimension_numbers<[1], [0], [0], [1], [0, 0, 1, 1], [], []>} : vector<16x128xbf16>, vector<128x32xbf16>, vector<16x32xf32> -> vector<16x32xf32>
    %c0_3 = arith.constant 0 : index
    %c0_4 = arith.constant 0 : index
    %9 = vector.load %arg6[%c0_3, %c0_4] : memref<16x32xbf16, #tpu.memory_space<vmem>>, vector<16x32xbf16>
    %10 = arith.extf %9 : vector<16x32xbf16> to vector<16x32xf32>
    %11 = vector.extract_strided_slice %10 {offsets = [0, 0], sizes = [8, 32], strides = [1, 1]} : vector<16x32xf32> to vector<8x32xf32>
    %12 = tpu.concatenate %11, %11 in 0 : vector<8x32xf32>, vector<8x32xf32> -> vector<16x32xf32>
    %c0_5 = arith.constant 0 : index
    %c0_6 = arith.constant 0 : index
    %13 = vector.load %arg2[%c0_5, %c0_6] : memref<16x1xi32, #tpu.memory_space<vmem>>, vector<16x1xi32>
    %c0_7 = arith.constant 0 : index
    %c0_8 = arith.constant 0 : index
    %14 = vector.load %arg7[%c0_7, %c0_8] : memref<2x32xbf16, #tpu.memory_space<vmem>>, vector<2x32xbf16>
    %15 = arith.extf %14 : vector<2x32xbf16> to vector<2x32xf32>
    %cst_9 = arith.constant 0.000000e+00 : f32
    %16 = vector.broadcast %cst_9 : f32 to vector<16x32xf32>
    %c0_i32 = arith.constant 0 : i32
    %17 = vector.broadcast %c0_i32 : i32 to vector<16x1xi32>
    %18 = arith.cmpi eq, %13, %17 : vector<16x1xi32>
    %19 = vector.extract_strided_slice %15 {offsets = [0, 0], sizes = [1, 32], strides = [1, 1]} : vector<2x32xf32> to vector<1x32xf32>
    %cst_10 = arith.constant 0.000000e+00 : f32
    %20 = vector.shape_cast %18 : vector<16x1xi1> to vector<16x1xi1>
    %21 = vector.broadcast %20 : vector<16x1xi1> to vector<16x32xi1>
    %22 = vector.shape_cast %19 : vector<1x32xf32> to vector<1x32xf32>
    %23 = vector.broadcast %22 : vector<1x32xf32> to vector<16x32xf32>
    %24 = vector.broadcast %cst_10 : f32 to vector<16x32xf32>
    %25 = arith.select %21, %23, %24 : vector<16x32xi1>, vector<16x32xf32>
    %26 = arith.addf %16, %25 : vector<16x32xf32>
    %c1_i32 = arith.constant 1 : i32
    %27 = vector.broadcast %c1_i32 : i32 to vector<16x1xi32>
    %28 = arith.cmpi eq, %13, %27 : vector<16x1xi32>
    %29 = vector.extract_strided_slice %15 {offsets = [1, 0], sizes = [1, 32], strides = [1, 1]} : vector<2x32xf32> to vector<1x32xf32>
    %cst_11 = arith.constant 0.000000e+00 : f32
    %30 = vector.shape_cast %28 : vector<16x1xi1> to vector<16x1xi1>
    %31 = vector.broadcast %30 : vector<16x1xi1> to vector<16x32xi1>
    %32 = vector.shape_cast %29 : vector<1x32xf32> to vector<1x32xf32>
    %33 = vector.broadcast %32 : vector<1x32xf32> to vector<16x32xf32>
    %34 = vector.broadcast %cst_11 : f32 to vector<16x32xf32>
    %35 = arith.select %31, %33, %34 : vector<16x32xi1>, vector<16x32xf32>
    %36 = arith.addf %26, %35 : vector<16x32xf32>
    %37 = arith.addf %8, %12 : vector<16x32xf32>
    %38 = arith.addf %37, %36 : vector<16x32xf32>
    %c0_12 = arith.constant 0 : index
    %c0_13 = arith.constant 0 : index
    %39 = vector.load %arg8[%c0_12, %c0_13] : memref<1x32xf32, #tpu.memory_space<vmem>>, vector<1x32xf32>
    %c0_14 = arith.constant 0 : index
    %c0_15 = arith.constant 0 : index
    %40 = vector.load %arg9[%c0_14, %c0_15] : memref<1x32xf32, #tpu.memory_space<vmem>>, vector<1x32xf32>
    %cst_16 = arith.constant dense<0.000000e+00> : vector<16xf32>
    %41 = vector.multi_reduction <add>, %38, %cst_16 [1] : vector<16x32xf32> to vector<16xf32>
    %42 = vector.shape_cast %41 : vector<16xf32> to vector<16x1xf32>
    %cst_17 = arith.constant 3.200000e+01 : f32
    %43 = vector.broadcast %cst_17 : f32 to vector<16x1xf32>
    %44 = arith.divf %42, %43 : vector<16x1xf32>
    %45 = vector.broadcast %44 : vector<16x1xf32> to vector<16x32xf32>
    %46 = arith.subf %38, %45 : vector<16x32xf32>
    %47 = vector.broadcast %44 : vector<16x1xf32> to vector<16x32xf32>
    %48 = arith.subf %38, %47 : vector<16x32xf32>
    %49 = arith.mulf %46, %48 : vector<16x32xf32>
    %cst_18 = arith.constant dense<0.000000e+00> : vector<16xf32>
    %50 = vector.multi_reduction <add>, %49, %cst_18 [1] : vector<16x32xf32> to vector<16xf32>
    %51 = vector.shape_cast %50 : vector<16xf32> to vector<16x1xf32>
    %cst_19 = arith.constant 3.200000e+01 : f32
    %52 = vector.broadcast %cst_19 : f32 to vector<16x1xf32>
    %53 = arith.divf %51, %52 : vector<16x1xf32>
    %54 = vector.broadcast %44 : vector<16x1xf32> to vector<16x32xf32>
    %55 = arith.subf %38, %54 : vector<16x32xf32>
    %cst_20 = arith.constant 9.99999996E-13 : f32
    %56 = vector.broadcast %cst_20 : f32 to vector<16x1xf32>
    %57 = arith.addf %53, %56 : vector<16x1xf32>
    %58 = math.rsqrt %57 : vector<16x1xf32>
    %59 = vector.broadcast %58 : vector<16x1xf32> to vector<16x32xf32>
    %60 = arith.mulf %55, %59 : vector<16x32xf32>
    %61 = vector.broadcast %39 : vector<1x32xf32> to vector<16x32xf32>
    %62 = arith.mulf %60, %61 : vector<16x32xf32>
    %63 = vector.broadcast %40 : vector<1x32xf32> to vector<16x32xf32>
    %64 = arith.addf %62, %63 : vector<16x32xf32>
    %c0_21 = arith.constant 0 : index
    %c0_22 = arith.constant 0 : index
    %65 = vector.load %arg3[%c0_21, %c0_22] : memref<2x8xf32, #tpu.memory_space<vmem>>, vector<2x8xf32>
    %cst_23 = arith.constant 1.000000e+00 : f32
    %66 = vector.broadcast %cst_23 : f32 to vector<2x8xf32>
    %67 = arith.subf %66, %65 : vector<2x8xf32>
    %cst_24 = arith.constant -1.000000e+09 : f32
    %68 = vector.broadcast %cst_24 : f32 to vector<2x8xf32>
    %69 = arith.mulf %67, %68 : vector<2x8xf32>
    %c0_25 = arith.constant 0 : index
    %c0_26 = arith.constant 0 : index
    %c0_27 = arith.constant 0 : index
    %70 = vector.load %arg10[%c0_25, %c0_26, %c0_27] : memref<2x32x96xbf16, #tpu.memory_space<vmem>>, vector<1x32x96xbf16>
    %71 = vector.shape_cast %70 : vector<1x32x96xbf16> to vector<32x96xbf16>
    %72 = arith.truncf %64 : vector<16x32xf32> to vector<16x32xbf16>
    %cst_28 = arith.constant dense<0.000000e+00> : vector<16x96xf32>
    %73 = tpu.matmul %72, %71, %cst_28 {dimension_numbers = #tpu.dot_dimension_numbers<[1], [0], [0], [1], [0, 0, 1, 1], [], []>} : vector<16x32xbf16>, vector<32x96xbf16>, vector<16x96xf32> -> vector<16x96xf32>
    %c0_29 = arith.constant 0 : index
    %c0_30 = arith.constant 0 : index
    %c0_31 = arith.constant 0 : index
    %74 = vector.load %arg11[%c0_29, %c0_30, %c0_31] : memref<2x1x96xf32, #tpu.memory_space<vmem>>, vector<1x1x96xf32>
    %75 = vector.shape_cast %74 : vector<1x1x96xf32> to vector<1x96xf32>
    %76 = vector.broadcast %75 : vector<1x96xf32> to vector<16x96xf32>
    %77 = arith.addf %73, %76 : vector<16x96xf32>
    %78 = vector.extract_strided_slice %69 {offsets = [0, 0], sizes = [1, 8], strides = [1, 1]} : vector<2x8xf32> to vector<1x8xf32>
    %79 = vector.extract_strided_slice %77 {offsets = [0, 0], sizes = [8, 16], strides = [1, 1]} : vector<16x96xf32> to vector<8x16xf32>
    %80 = vector.extract_strided_slice %77 {offsets = [0, 32], sizes = [8, 16], strides = [1, 1]} : vector<16x96xf32> to vector<8x16xf32>
    %81 = vector.extract_strided_slice %77 {offsets = [0, 64], sizes = [8, 16], strides = [1, 1]} : vector<16x96xf32> to vector<8x16xf32>
    %82 = arith.truncf %79 : vector<8x16xf32> to vector<8x16xbf16>
    %83 = arith.truncf %80 : vector<8x16xf32> to vector<8x16xbf16>
    %cst_32 = arith.constant dense<0.000000e+00> : vector<8x8xf32>
    %84 = tpu.matmul %82, %83, %cst_32 {dimension_numbers = #tpu.dot_dimension_numbers<[1], [1], [0], [0], [0, 0, 1, 0], [], []>} : vector<8x16xbf16>, vector<8x16xbf16>, vector<8x8xf32> -> vector<8x8xf32>
    %cst_33 = arith.constant 2.500000e-01 : f32
    %85 = vector.broadcast %cst_33 : f32 to vector<8x8xf32>
    %86 = arith.mulf %84, %85 : vector<8x8xf32>
    %87 = vector.broadcast %78 : vector<1x8xf32> to vector<8x8xf32>
    %88 = arith.addf %86, %87 : vector<8x8xf32>
    %cst_34 = arith.constant dense<0xFF800000> : vector<8xf32>
    %89 = vector.multi_reduction <maximumf>, %88, %cst_34 [1] : vector<8x8xf32> to vector<8xf32>
    %90 = vector.shape_cast %89 : vector<8xf32> to vector<8x1xf32>
    %91 = vector.broadcast %90 : vector<8x1xf32> to vector<8x8xf32>
    %92 = arith.subf %88, %91 : vector<8x8xf32>
    %93 = math.exp %92 : vector<8x8xf32>
    %cst_35 = arith.constant dense<0.000000e+00> : vector<8xf32>
    %94 = vector.multi_reduction <add>, %93, %cst_35 [1] : vector<8x8xf32> to vector<8xf32>
    %95 = vector.shape_cast %94 : vector<8xf32> to vector<8x1xf32>
    %96 = vector.broadcast %95 : vector<8x1xf32> to vector<8x8xf32>
    %97 = arith.divf %93, %96 : vector<8x8xf32>
    %98 = arith.truncf %97 : vector<8x8xf32> to vector<8x8xbf16>
    %99 = arith.truncf %81 : vector<8x16xf32> to vector<8x16xbf16>
    %cst_36 = arith.constant dense<0.000000e+00> : vector<8x16xf32>
    %100 = tpu.matmul %98, %99, %cst_36 {dimension_numbers = #tpu.dot_dimension_numbers<[1], [0], [0], [1], [0, 0, 1, 1], [], []>} : vector<8x8xbf16>, vector<8x16xbf16>, vector<8x16xf32> -> vector<8x16xf32>
    %101 = vector.extract_strided_slice %77 {offsets = [0, 16], sizes = [8, 16], strides = [1, 1]} : vector<16x96xf32> to vector<8x16xf32>
    %102 = vector.extract_strided_slice %77 {offsets = [0, 48], sizes = [8, 16], strides = [1, 1]} : vector<16x96xf32> to vector<8x16xf32>
    %103 = vector.extract_strided_slice %77 {offsets = [0, 80], sizes = [8, 16], strides = [1, 1]} : vector<16x96xf32> to vector<8x16xf32>
    %104 = arith.truncf %101 : vector<8x16xf32> to vector<8x16xbf16>
    %105 = arith.truncf %102 : vector<8x16xf32> to vector<8x16xbf16>
    %cst_37 = arith.constant dense<0.000000e+00> : vector<8x8xf32>
    %106 = tpu.matmul %104, %105, %cst_37 {dimension_numbers = #tpu.dot_dimension_numbers<[1], [1], [0], [0], [0, 0, 1, 0], [], []>} : vector<8x16xbf16>, vector<8x16xbf16>, vector<8x8xf32> -> vector<8x8xf32>
    %cst_38 = arith.constant 2.500000e-01 : f32
    %107 = vector.broadcast %cst_38 : f32 to vector<8x8xf32>
    %108 = arith.mulf %106, %107 : vector<8x8xf32>
    %109 = vector.broadcast %78 : vector<1x8xf32> to vector<8x8xf32>
    %110 = arith.addf %108, %109 : vector<8x8xf32>
    %cst_39 = arith.constant dense<0xFF800000> : vector<8xf32>
    %111 = vector.multi_reduction <maximumf>, %110, %cst_39 [1] : vector<8x8xf32> to vector<8xf32>
    %112 = vector.shape_cast %111 : vector<8xf32> to vector<8x1xf32>
    %113 = vector.broadcast %112 : vector<8x1xf32> to vector<8x8xf32>
    %114 = arith.subf %110, %113 : vector<8x8xf32>
    %115 = math.exp %114 : vector<8x8xf32>
    %cst_40 = arith.constant dense<0.000000e+00> : vector<8xf32>
    %116 = vector.multi_reduction <add>, %115, %cst_40 [1] : vector<8x8xf32> to vector<8xf32>
    %117 = vector.shape_cast %116 : vector<8xf32> to vector<8x1xf32>
    %118 = vector.broadcast %117 : vector<8x1xf32> to vector<8x8xf32>
    %119 = arith.divf %115, %118 : vector<8x8xf32>
    %120 = arith.truncf %119 : vector<8x8xf32> to vector<8x8xbf16>
    %121 = arith.truncf %103 : vector<8x16xf32> to vector<8x16xbf16>
    %cst_41 = arith.constant dense<0.000000e+00> : vector<8x16xf32>
    %122 = tpu.matmul %120, %121, %cst_41 {dimension_numbers = #tpu.dot_dimension_numbers<[1], [0], [0], [1], [0, 0, 1, 1], [], []>} : vector<8x8xbf16>, vector<8x16xbf16>, vector<8x16xf32> -> vector<8x16xf32>
    %123 = tpu.concatenate %100, %122 in 1 : vector<8x16xf32>, vector<8x16xf32> -> vector<8x32xf32>
    %124 = vector.extract_strided_slice %69 {offsets = [1, 0], sizes = [1, 8], strides = [1, 1]} : vector<2x8xf32> to vector<1x8xf32>
    %125 = vector.extract_strided_slice %77 {offsets = [8, 0], sizes = [8, 16], strides = [1, 1]} : vector<16x96xf32> to vector<8x16xf32>
    %126 = vector.extract_strided_slice %77 {offsets = [8, 32], sizes = [8, 16], strides = [1, 1]} : vector<16x96xf32> to vector<8x16xf32>
    %127 = vector.extract_strided_slice %77 {offsets = [8, 64], sizes = [8, 16], strides = [1, 1]} : vector<16x96xf32> to vector<8x16xf32>
    %128 = arith.truncf %125 : vector<8x16xf32> to vector<8x16xbf16>
    %129 = arith.truncf %126 : vector<8x16xf32> to vector<8x16xbf16>
    %cst_42 = arith.constant dense<0.000000e+00> : vector<8x8xf32>
    %130 = tpu.matmul %128, %129, %cst_42 {dimension_numbers = #tpu.dot_dimension_numbers<[1], [1], [0], [0], [0, 0, 1, 0], [], []>} : vector<8x16xbf16>, vector<8x16xbf16>, vector<8x8xf32> -> vector<8x8xf32>
    %cst_43 = arith.constant 2.500000e-01 : f32
    %131 = vector.broadcast %cst_43 : f32 to vector<8x8xf32>
    %132 = arith.mulf %130, %131 : vector<8x8xf32>
    %133 = vector.broadcast %124 : vector<1x8xf32> to vector<8x8xf32>
    %134 = arith.addf %132, %133 : vector<8x8xf32>
    %cst_44 = arith.constant dense<0xFF800000> : vector<8xf32>
    %135 = vector.multi_reduction <maximumf>, %134, %cst_44 [1] : vector<8x8xf32> to vector<8xf32>
    %136 = vector.shape_cast %135 : vector<8xf32> to vector<8x1xf32>
    %137 = vector.broadcast %136 : vector<8x1xf32> to vector<8x8xf32>
    %138 = arith.subf %134, %137 : vector<8x8xf32>
    %139 = math.exp %138 : vector<8x8xf32>
    %cst_45 = arith.constant dense<0.000000e+00> : vector<8xf32>
    %140 = vector.multi_reduction <add>, %139, %cst_45 [1] : vector<8x8xf32> to vector<8xf32>
    %141 = vector.shape_cast %140 : vector<8xf32> to vector<8x1xf32>
    %142 = vector.broadcast %141 : vector<8x1xf32> to vector<8x8xf32>
    %143 = arith.divf %139, %142 : vector<8x8xf32>
    %144 = arith.truncf %143 : vector<8x8xf32> to vector<8x8xbf16>
    %145 = arith.truncf %127 : vector<8x16xf32> to vector<8x16xbf16>
    %cst_46 = arith.constant dense<0.000000e+00> : vector<8x16xf32>
    %146 = tpu.matmul %144, %145, %cst_46 {dimension_numbers = #tpu.dot_dimension_numbers<[1], [0], [0], [1], [0, 0, 1, 1], [], []>} : vector<8x8xbf16>, vector<8x16xbf16>, vector<8x16xf32> -> vector<8x16xf32>
    %147 = vector.extract_strided_slice %77 {offsets = [8, 16], sizes = [8, 16], strides = [1, 1]} : vector<16x96xf32> to vector<8x16xf32>
    %148 = vector.extract_strided_slice %77 {offsets = [8, 48], sizes = [8, 16], strides = [1, 1]} : vector<16x96xf32> to vector<8x16xf32>
    %149 = vector.extract_strided_slice %77 {offsets = [8, 80], sizes = [8, 16], strides = [1, 1]} : vector<16x96xf32> to vector<8x16xf32>
    %150 = arith.truncf %147 : vector<8x16xf32> to vector<8x16xbf16>
    %151 = arith.truncf %148 : vector<8x16xf32> to vector<8x16xbf16>
    %cst_47 = arith.constant dense<0.000000e+00> : vector<8x8xf32>
    %152 = tpu.matmul %150, %151, %cst_47 {dimension_numbers = #tpu.dot_dimension_numbers<[1], [1], [0], [0], [0, 0, 1, 0], [], []>} : vector<8x16xbf16>, vector<8x16xbf16>, vector<8x8xf32> -> vector<8x8xf32>
    %cst_48 = arith.constant 2.500000e-01 : f32
    %153 = vector.broadcast %cst_48 : f32 to vector<8x8xf32>
    %154 = arith.mulf %152, %153 : vector<8x8xf32>
    %155 = vector.broadcast %124 : vector<1x8xf32> to vector<8x8xf32>
    %156 = arith.addf %154, %155 : vector<8x8xf32>
    %cst_49 = arith.constant dense<0xFF800000> : vector<8xf32>
    %157 = vector.multi_reduction <maximumf>, %156, %cst_49 [1] : vector<8x8xf32> to vector<8xf32>
    %158 = vector.shape_cast %157 : vector<8xf32> to vector<8x1xf32>
    %159 = vector.broadcast %158 : vector<8x1xf32> to vector<8x8xf32>
    %160 = arith.subf %156, %159 : vector<8x8xf32>
    %161 = math.exp %160 : vector<8x8xf32>
    %cst_50 = arith.constant dense<0.000000e+00> : vector<8xf32>
    %162 = vector.multi_reduction <add>, %161, %cst_50 [1] : vector<8x8xf32> to vector<8xf32>
    %163 = vector.shape_cast %162 : vector<8xf32> to vector<8x1xf32>
    %164 = vector.broadcast %163 : vector<8x1xf32> to vector<8x8xf32>
    %165 = arith.divf %161, %164 : vector<8x8xf32>
    %166 = arith.truncf %165 : vector<8x8xf32> to vector<8x8xbf16>
    %167 = arith.truncf %149 : vector<8x16xf32> to vector<8x16xbf16>
    %cst_51 = arith.constant dense<0.000000e+00> : vector<8x16xf32>
    %168 = tpu.matmul %166, %167, %cst_51 {dimension_numbers = #tpu.dot_dimension_numbers<[1], [0], [0], [1], [0, 0, 1, 1], [], []>} : vector<8x8xbf16>, vector<8x16xbf16>, vector<8x16xf32> -> vector<8x16xf32>
    %169 = tpu.concatenate %146, %168 in 1 : vector<8x16xf32>, vector<8x16xf32> -> vector<8x32xf32>
    %170 = tpu.concatenate %123, %169 in 0 : vector<8x32xf32>, vector<8x32xf32> -> vector<16x32xf32>
    %c0_52 = arith.constant 0 : index
    %c0_53 = arith.constant 0 : index
    %c0_54 = arith.constant 0 : index
    %171 = vector.load %arg12[%c0_52, %c0_53, %c0_54] : memref<2x32x32xbf16, #tpu.memory_space<vmem>>, vector<1x32x32xbf16>
    %172 = vector.shape_cast %171 : vector<1x32x32xbf16> to vector<32x32xbf16>
    %173 = arith.truncf %170 : vector<16x32xf32> to vector<16x32xbf16>
    %cst_55 = arith.constant dense<0.000000e+00> : vector<16x32xf32>
    %174 = tpu.matmul %173, %172, %cst_55 {dimension_numbers = #tpu.dot_dimension_numbers<[1], [0], [0], [1], [0, 0, 1, 1], [], []>} : vector<16x32xbf16>, vector<32x32xbf16>, vector<16x32xf32> -> vector<16x32xf32>
    %c0_56 = arith.constant 0 : index
    %c0_57 = arith.constant 0 : index
    %c0_58 = arith.constant 0 : index
    %175 = vector.load %arg13[%c0_56, %c0_57, %c0_58] : memref<2x1x32xf32, #tpu.memory_space<vmem>>, vector<1x1x32xf32>
    %176 = vector.shape_cast %175 : vector<1x1x32xf32> to vector<1x32xf32>
    %177 = vector.broadcast %176 : vector<1x32xf32> to vector<16x32xf32>
    %178 = arith.addf %174, %177 : vector<16x32xf32>
    %179 = arith.addf %178, %64 : vector<16x32xf32>
    %c0_59 = arith.constant 0 : index
    %c0_60 = arith.constant 0 : index
    %c0_61 = arith.constant 0 : index
    %180 = vector.load %arg14[%c0_59, %c0_60, %c0_61] : memref<2x1x32xf32, #tpu.memory_space<vmem>>, vector<1x1x32xf32>
    %181 = vector.shape_cast %180 : vector<1x1x32xf32> to vector<1x32xf32>
    %c0_62 = arith.constant 0 : index
    %c0_63 = arith.constant 0 : index
    %c0_64 = arith.constant 0 : index
    %182 = vector.load %arg15[%c0_62, %c0_63, %c0_64] : memref<2x1x32xf32, #tpu.memory_space<vmem>>, vector<1x1x32xf32>
    %183 = vector.shape_cast %182 : vector<1x1x32xf32> to vector<1x32xf32>
    %cst_65 = arith.constant dense<0.000000e+00> : vector<16xf32>
    %184 = vector.multi_reduction <add>, %179, %cst_65 [1] : vector<16x32xf32> to vector<16xf32>
    %185 = vector.shape_cast %184 : vector<16xf32> to vector<16x1xf32>
    %cst_66 = arith.constant 3.200000e+01 : f32
    %186 = vector.broadcast %cst_66 : f32 to vector<16x1xf32>
    %187 = arith.divf %185, %186 : vector<16x1xf32>
    %188 = vector.broadcast %187 : vector<16x1xf32> to vector<16x32xf32>
    %189 = arith.subf %179, %188 : vector<16x32xf32>
    %190 = vector.broadcast %187 : vector<16x1xf32> to vector<16x32xf32>
    %191 = arith.subf %179, %190 : vector<16x32xf32>
    %192 = arith.mulf %189, %191 : vector<16x32xf32>
    %cst_67 = arith.constant dense<0.000000e+00> : vector<16xf32>
    %193 = vector.multi_reduction <add>, %192, %cst_67 [1] : vector<16x32xf32> to vector<16xf32>
    %194 = vector.shape_cast %193 : vector<16xf32> to vector<16x1xf32>
    %cst_68 = arith.constant 3.200000e+01 : f32
    %195 = vector.broadcast %cst_68 : f32 to vector<16x1xf32>
    %196 = arith.divf %194, %195 : vector<16x1xf32>
    %197 = vector.broadcast %187 : vector<16x1xf32> to vector<16x32xf32>
    %198 = arith.subf %179, %197 : vector<16x32xf32>
    %cst_69 = arith.constant 9.99999996E-13 : f32
    %199 = vector.broadcast %cst_69 : f32 to vector<16x1xf32>
    %200 = arith.addf %196, %199 : vector<16x1xf32>
    %201 = math.rsqrt %200 : vector<16x1xf32>
    %202 = vector.broadcast %201 : vector<16x1xf32> to vector<16x32xf32>
    %203 = arith.mulf %198, %202 : vector<16x32xf32>
    %204 = vector.broadcast %181 : vector<1x32xf32> to vector<16x32xf32>
    %205 = arith.mulf %203, %204 : vector<16x32xf32>
    %206 = vector.broadcast %183 : vector<1x32xf32> to vector<16x32xf32>
    %207 = arith.addf %205, %206 : vector<16x32xf32>
    %c0_70 = arith.constant 0 : index
    %c0_71 = arith.constant 0 : index
    %c0_72 = arith.constant 0 : index
    %208 = vector.load %arg16[%c0_70, %c0_71, %c0_72] : memref<2x32x64xbf16, #tpu.memory_space<vmem>>, vector<1x32x64xbf16>
    %209 = vector.shape_cast %208 : vector<1x32x64xbf16> to vector<32x64xbf16>
    %210 = arith.truncf %207 : vector<16x32xf32> to vector<16x32xbf16>
    %cst_73 = arith.constant dense<0.000000e+00> : vector<16x64xf32>
    %211 = tpu.matmul %210, %209, %cst_73 {dimension_numbers = #tpu.dot_dimension_numbers<[1], [0], [0], [1], [0, 0, 1, 1], [], []>} : vector<16x32xbf16>, vector<32x64xbf16>, vector<16x64xf32> -> vector<16x64xf32>
    %c0_74 = arith.constant 0 : index
    %c0_75 = arith.constant 0 : index
    %c0_76 = arith.constant 0 : index
    %212 = vector.load %arg17[%c0_74, %c0_75, %c0_76] : memref<2x1x64xf32, #tpu.memory_space<vmem>>, vector<1x1x64xf32>
    %213 = vector.shape_cast %212 : vector<1x1x64xf32> to vector<1x64xf32>
    %214 = vector.broadcast %213 : vector<1x64xf32> to vector<16x64xf32>
    %215 = arith.addf %211, %214 : vector<16x64xf32>
    %cst_77 = arith.constant 5.000000e-01 : f32
    %216 = vector.broadcast %cst_77 : f32 to vector<16x64xf32>
    %217 = arith.mulf %216, %215 : vector<16x64xf32>
    %cst_78 = arith.constant 0.707106769 : f32
    %218 = vector.broadcast %cst_78 : f32 to vector<16x64xf32>
    %219 = arith.mulf %215, %218 : vector<16x64xf32>
    %220 = math.erf %219 : vector<16x64xf32>
    %cst_79 = arith.constant 1.000000e+00 : f32
    %221 = vector.broadcast %cst_79 : f32 to vector<16x64xf32>
    %222 = arith.addf %221, %220 : vector<16x64xf32>
    %223 = arith.mulf %217, %222 : vector<16x64xf32>
    %c0_80 = arith.constant 0 : index
    %c0_81 = arith.constant 0 : index
    %c0_82 = arith.constant 0 : index
    %224 = vector.load %arg18[%c0_80, %c0_81, %c0_82] : memref<2x64x32xbf16, #tpu.memory_space<vmem>>, vector<1x64x32xbf16>
    %225 = vector.shape_cast %224 : vector<1x64x32xbf16> to vector<64x32xbf16>
    %226 = arith.truncf %223 : vector<16x64xf32> to vector<16x64xbf16>
    %cst_83 = arith.constant dense<0.000000e+00> : vector<16x32xf32>
    %227 = tpu.matmul %226, %225, %cst_83 {dimension_numbers = #tpu.dot_dimension_numbers<[1], [0], [0], [1], [0, 0, 1, 1], [], []>} : vector<16x64xbf16>, vector<64x32xbf16>, vector<16x32xf32> -> vector<16x32xf32>
    %c0_84 = arith.constant 0 : index
    %c0_85 = arith.constant 0 : index
    %c0_86 = arith.constant 0 : index
    %228 = vector.load %arg19[%c0_84, %c0_85, %c0_86] : memref<2x1x32xf32, #tpu.memory_space<vmem>>, vector<1x1x32xf32>
    %229 = vector.shape_cast %228 : vector<1x1x32xf32> to vector<1x32xf32>
    %230 = vector.broadcast %229 : vector<1x32xf32> to vector<16x32xf32>
    %231 = arith.addf %227, %230 : vector<16x32xf32>
    %232 = arith.addf %231, %207 : vector<16x32xf32>
    %c0_87 = arith.constant 0 : index
    %c0_88 = arith.constant 0 : index
    %c0_89 = arith.constant 0 : index
    %233 = vector.load %arg20[%c0_87, %c0_88, %c0_89] : memref<2x1x32xf32, #tpu.memory_space<vmem>>, vector<1x1x32xf32>
    %234 = vector.shape_cast %233 : vector<1x1x32xf32> to vector<1x32xf32>
    %c0_90 = arith.constant 0 : index
    %c0_91 = arith.constant 0 : index
    %c0_92 = arith.constant 0 : index
    %235 = vector.load %arg21[%c0_90, %c0_91, %c0_92] : memref<2x1x32xf32, #tpu.memory_space<vmem>>, vector<1x1x32xf32>
    %236 = vector.shape_cast %235 : vector<1x1x32xf32> to vector<1x32xf32>
    %cst_93 = arith.constant dense<0.000000e+00> : vector<16xf32>
    %237 = vector.multi_reduction <add>, %232, %cst_93 [1] : vector<16x32xf32> to vector<16xf32>
    %238 = vector.shape_cast %237 : vector<16xf32> to vector<16x1xf32>
    %cst_94 = arith.constant 3.200000e+01 : f32
    %239 = vector.broadcast %cst_94 : f32 to vector<16x1xf32>
    %240 = arith.divf %238, %239 : vector<16x1xf32>
    %241 = vector.broadcast %240 : vector<16x1xf32> to vector<16x32xf32>
    %242 = arith.subf %232, %241 : vector<16x32xf32>
    %243 = vector.broadcast %240 : vector<16x1xf32> to vector<16x32xf32>
    %244 = arith.subf %232, %243 : vector<16x32xf32>
    %245 = arith.mulf %242, %244 : vector<16x32xf32>
    %cst_95 = arith.constant dense<0.000000e+00> : vector<16xf32>
    %246 = vector.multi_reduction <add>, %245, %cst_95 [1] : vector<16x32xf32> to vector<16xf32>
    %247 = vector.shape_cast %246 : vector<16xf32> to vector<16x1xf32>
    %cst_96 = arith.constant 3.200000e+01 : f32
    %248 = vector.broadcast %cst_96 : f32 to vector<16x1xf32>
    %249 = arith.divf %247, %248 : vector<16x1xf32>
    %250 = vector.broadcast %240 : vector<16x1xf32> to vector<16x32xf32>
    %251 = arith.subf %232, %250 : vector<16x32xf32>
    %cst_97 = arith.constant 9.99999996E-13 : f32
    %252 = vector.broadcast %cst_97 : f32 to vector<16x1xf32>
    %253 = arith.addf %249, %252 : vector<16x1xf32>
    %254 = math.rsqrt %253 : vector<16x1xf32>
    %255 = vector.broadcast %254 : vector<16x1xf32> to vector<16x32xf32>
    %256 = arith.mulf %251, %255 : vector<16x32xf32>
    %257 = vector.broadcast %234 : vector<1x32xf32> to vector<16x32xf32>
    %258 = arith.mulf %256, %257 : vector<16x32xf32>
    %259 = vector.broadcast %236 : vector<1x32xf32> to vector<16x32xf32>
    %260 = arith.addf %258, %259 : vector<16x32xf32>
    %c1 = arith.constant 1 : index
    %c0_98 = arith.constant 0 : index
    %c0_99 = arith.constant 0 : index
    %261 = vector.load %arg10[%c1, %c0_98, %c0_99] : memref<2x32x96xbf16, #tpu.memory_space<vmem>>, vector<1x32x96xbf16>
    %262 = vector.shape_cast %261 : vector<1x32x96xbf16> to vector<32x96xbf16>
    %263 = arith.truncf %260 : vector<16x32xf32> to vector<16x32xbf16>
    %cst_100 = arith.constant dense<0.000000e+00> : vector<16x96xf32>
    %264 = tpu.matmul %263, %262, %cst_100 {dimension_numbers = #tpu.dot_dimension_numbers<[1], [0], [0], [1], [0, 0, 1, 1], [], []>} : vector<16x32xbf16>, vector<32x96xbf16>, vector<16x96xf32> -> vector<16x96xf32>
    %c1_101 = arith.constant 1 : index
    %c0_102 = arith.constant 0 : index
    %c0_103 = arith.constant 0 : index
    %265 = vector.load %arg11[%c1_101, %c0_102, %c0_103] : memref<2x1x96xf32, #tpu.memory_space<vmem>>, vector<1x1x96xf32>
    %266 = vector.shape_cast %265 : vector<1x1x96xf32> to vector<1x96xf32>
    %267 = vector.broadcast %266 : vector<1x96xf32> to vector<16x96xf32>
    %268 = arith.addf %264, %267 : vector<16x96xf32>
    %269 = vector.extract_strided_slice %69 {offsets = [0, 0], sizes = [1, 8], strides = [1, 1]} : vector<2x8xf32> to vector<1x8xf32>
    %270 = vector.extract_strided_slice %268 {offsets = [0, 0], sizes = [8, 16], strides = [1, 1]} : vector<16x96xf32> to vector<8x16xf32>
    %271 = vector.extract_strided_slice %268 {offsets = [0, 32], sizes = [8, 16], strides = [1, 1]} : vector<16x96xf32> to vector<8x16xf32>
    %272 = vector.extract_strided_slice %268 {offsets = [0, 64], sizes = [8, 16], strides = [1, 1]} : vector<16x96xf32> to vector<8x16xf32>
    %273 = arith.truncf %270 : vector<8x16xf32> to vector<8x16xbf16>
    %274 = arith.truncf %271 : vector<8x16xf32> to vector<8x16xbf16>
    %cst_104 = arith.constant dense<0.000000e+00> : vector<8x8xf32>
    %275 = tpu.matmul %273, %274, %cst_104 {dimension_numbers = #tpu.dot_dimension_numbers<[1], [1], [0], [0], [0, 0, 1, 0], [], []>} : vector<8x16xbf16>, vector<8x16xbf16>, vector<8x8xf32> -> vector<8x8xf32>
    %cst_105 = arith.constant 2.500000e-01 : f32
    %276 = vector.broadcast %cst_105 : f32 to vector<8x8xf32>
    %277 = arith.mulf %275, %276 : vector<8x8xf32>
    %278 = vector.broadcast %269 : vector<1x8xf32> to vector<8x8xf32>
    %279 = arith.addf %277, %278 : vector<8x8xf32>
    %cst_106 = arith.constant dense<0xFF800000> : vector<8xf32>
    %280 = vector.multi_reduction <maximumf>, %279, %cst_106 [1] : vector<8x8xf32> to vector<8xf32>
    %281 = vector.shape_cast %280 : vector<8xf32> to vector<8x1xf32>
    %282 = vector.broadcast %281 : vector<8x1xf32> to vector<8x8xf32>
    %283 = arith.subf %279, %282 : vector<8x8xf32>
    %284 = math.exp %283 : vector<8x8xf32>
    %cst_107 = arith.constant dense<0.000000e+00> : vector<8xf32>
    %285 = vector.multi_reduction <add>, %284, %cst_107 [1] : vector<8x8xf32> to vector<8xf32>
    %286 = vector.shape_cast %285 : vector<8xf32> to vector<8x1xf32>
    %287 = vector.broadcast %286 : vector<8x1xf32> to vector<8x8xf32>
    %288 = arith.divf %284, %287 : vector<8x8xf32>
    %289 = arith.truncf %288 : vector<8x8xf32> to vector<8x8xbf16>
    %290 = arith.truncf %272 : vector<8x16xf32> to vector<8x16xbf16>
    %cst_108 = arith.constant dense<0.000000e+00> : vector<8x16xf32>
    %291 = tpu.matmul %289, %290, %cst_108 {dimension_numbers = #tpu.dot_dimension_numbers<[1], [0], [0], [1], [0, 0, 1, 1], [], []>} : vector<8x8xbf16>, vector<8x16xbf16>, vector<8x16xf32> -> vector<8x16xf32>
    %292 = vector.extract_strided_slice %268 {offsets = [0, 16], sizes = [8, 16], strides = [1, 1]} : vector<16x96xf32> to vector<8x16xf32>
    %293 = vector.extract_strided_slice %268 {offsets = [0, 48], sizes = [8, 16], strides = [1, 1]} : vector<16x96xf32> to vector<8x16xf32>
    %294 = vector.extract_strided_slice %268 {offsets = [0, 80], sizes = [8, 16], strides = [1, 1]} : vector<16x96xf32> to vector<8x16xf32>
    %295 = arith.truncf %292 : vector<8x16xf32> to vector<8x16xbf16>
    %296 = arith.truncf %293 : vector<8x16xf32> to vector<8x16xbf16>
    %cst_109 = arith.constant dense<0.000000e+00> : vector<8x8xf32>
    %297 = tpu.matmul %295, %296, %cst_109 {dimension_numbers = #tpu.dot_dimension_numbers<[1], [1], [0], [0], [0, 0, 1, 0], [], []>} : vector<8x16xbf16>, vector<8x16xbf16>, vector<8x8xf32> -> vector<8x8xf32>
    %cst_110 = arith.constant 2.500000e-01 : f32
    %298 = vector.broadcast %cst_110 : f32 to vector<8x8xf32>
    %299 = arith.mulf %297, %298 : vector<8x8xf32>
    %300 = vector.broadcast %269 : vector<1x8xf32> to vector<8x8xf32>
    %301 = arith.addf %299, %300 : vector<8x8xf32>
    %cst_111 = arith.constant dense<0xFF800000> : vector<8xf32>
    %302 = vector.multi_reduction <maximumf>, %301, %cst_111 [1] : vector<8x8xf32> to vector<8xf32>
    %303 = vector.shape_cast %302 : vector<8xf32> to vector<8x1xf32>
    %304 = vector.broadcast %303 : vector<8x1xf32> to vector<8x8xf32>
    %305 = arith.subf %301, %304 : vector<8x8xf32>
    %306 = math.exp %305 : vector<8x8xf32>
    %cst_112 = arith.constant dense<0.000000e+00> : vector<8xf32>
    %307 = vector.multi_reduction <add>, %306, %cst_112 [1] : vector<8x8xf32> to vector<8xf32>
    %308 = vector.shape_cast %307 : vector<8xf32> to vector<8x1xf32>
    %309 = vector.broadcast %308 : vector<8x1xf32> to vector<8x8xf32>
    %310 = arith.divf %306, %309 : vector<8x8xf32>
    %311 = arith.truncf %310 : vector<8x8xf32> to vector<8x8xbf16>
    %312 = arith.truncf %294 : vector<8x16xf32> to vector<8x16xbf16>
    %cst_113 = arith.constant dense<0.000000e+00> : vector<8x16xf32>
    %313 = tpu.matmul %311, %312, %cst_113 {dimension_numbers = #tpu.dot_dimension_numbers<[1], [0], [0], [1], [0, 0, 1, 1], [], []>} : vector<8x8xbf16>, vector<8x16xbf16>, vector<8x16xf32> -> vector<8x16xf32>
    %314 = tpu.concatenate %291, %313 in 1 : vector<8x16xf32>, vector<8x16xf32> -> vector<8x32xf32>
    %315 = vector.extract_strided_slice %69 {offsets = [1, 0], sizes = [1, 8], strides = [1, 1]} : vector<2x8xf32> to vector<1x8xf32>
    %316 = vector.extract_strided_slice %268 {offsets = [8, 0], sizes = [8, 16], strides = [1, 1]} : vector<16x96xf32> to vector<8x16xf32>
    %317 = vector.extract_strided_slice %268 {offsets = [8, 32], sizes = [8, 16], strides = [1, 1]} : vector<16x96xf32> to vector<8x16xf32>
    %318 = vector.extract_strided_slice %268 {offsets = [8, 64], sizes = [8, 16], strides = [1, 1]} : vector<16x96xf32> to vector<8x16xf32>
    %319 = arith.truncf %316 : vector<8x16xf32> to vector<8x16xbf16>
    %320 = arith.truncf %317 : vector<8x16xf32> to vector<8x16xbf16>
    %cst_114 = arith.constant dense<0.000000e+00> : vector<8x8xf32>
    %321 = tpu.matmul %319, %320, %cst_114 {dimension_numbers = #tpu.dot_dimension_numbers<[1], [1], [0], [0], [0, 0, 1, 0], [], []>} : vector<8x16xbf16>, vector<8x16xbf16>, vector<8x8xf32> -> vector<8x8xf32>
    %cst_115 = arith.constant 2.500000e-01 : f32
    %322 = vector.broadcast %cst_115 : f32 to vector<8x8xf32>
    %323 = arith.mulf %321, %322 : vector<8x8xf32>
    %324 = vector.broadcast %315 : vector<1x8xf32> to vector<8x8xf32>
    %325 = arith.addf %323, %324 : vector<8x8xf32>
    %cst_116 = arith.constant dense<0xFF800000> : vector<8xf32>
    %326 = vector.multi_reduction <maximumf>, %325, %cst_116 [1] : vector<8x8xf32> to vector<8xf32>
    %327 = vector.shape_cast %326 : vector<8xf32> to vector<8x1xf32>
    %328 = vector.broadcast %327 : vector<8x1xf32> to vector<8x8xf32>
    %329 = arith.subf %325, %328 : vector<8x8xf32>
    %330 = math.exp %329 : vector<8x8xf32>
    %cst_117 = arith.constant dense<0.000000e+00> : vector<8xf32>
    %331 = vector.multi_reduction <add>, %330, %cst_117 [1] : vector<8x8xf32> to vector<8xf32>
    %332 = vector.shape_cast %331 : vector<8xf32> to vector<8x1xf32>
    %333 = vector.broadcast %332 : vector<8x1xf32> to vector<8x8xf32>
    %334 = arith.divf %330, %333 : vector<8x8xf32>
    %335 = arith.truncf %334 : vector<8x8xf32> to vector<8x8xbf16>
    %336 = arith.truncf %318 : vector<8x16xf32> to vector<8x16xbf16>
    %cst_118 = arith.constant dense<0.000000e+00> : vector<8x16xf32>
    %337 = tpu.matmul %335, %336, %cst_118 {dimension_numbers = #tpu.dot_dimension_numbers<[1], [0], [0], [1], [0, 0, 1, 1], [], []>} : vector<8x8xbf16>, vector<8x16xbf16>, vector<8x16xf32> -> vector<8x16xf32>
    %338 = vector.extract_strided_slice %268 {offsets = [8, 16], sizes = [8, 16], strides = [1, 1]} : vector<16x96xf32> to vector<8x16xf32>
    %339 = vector.extract_strided_slice %268 {offsets = [8, 48], sizes = [8, 16], strides = [1, 1]} : vector<16x96xf32> to vector<8x16xf32>
    %340 = vector.extract_strided_slice %268 {offsets = [8, 80], sizes = [8, 16], strides = [1, 1]} : vector<16x96xf32> to vector<8x16xf32>
    %341 = arith.truncf %338 : vector<8x16xf32> to vector<8x16xbf16>
    %342 = arith.truncf %339 : vector<8x16xf32> to vector<8x16xbf16>
    %cst_119 = arith.constant dense<0.000000e+00> : vector<8x8xf32>
    %343 = tpu.matmul %341, %342, %cst_119 {dimension_numbers = #tpu.dot_dimension_numbers<[1], [1], [0], [0], [0, 0, 1, 0], [], []>} : vector<8x16xbf16>, vector<8x16xbf16>, vector<8x8xf32> -> vector<8x8xf32>
    %cst_120 = arith.constant 2.500000e-01 : f32
    %344 = vector.broadcast %cst_120 : f32 to vector<8x8xf32>
    %345 = arith.mulf %343, %344 : vector<8x8xf32>
    %346 = vector.broadcast %315 : vector<1x8xf32> to vector<8x8xf32>
    %347 = arith.addf %345, %346 : vector<8x8xf32>
    %cst_121 = arith.constant dense<0xFF800000> : vector<8xf32>
    %348 = vector.multi_reduction <maximumf>, %347, %cst_121 [1] : vector<8x8xf32> to vector<8xf32>
    %349 = vector.shape_cast %348 : vector<8xf32> to vector<8x1xf32>
    %350 = vector.broadcast %349 : vector<8x1xf32> to vector<8x8xf32>
    %351 = arith.subf %347, %350 : vector<8x8xf32>
    %352 = math.exp %351 : vector<8x8xf32>
    %cst_122 = arith.constant dense<0.000000e+00> : vector<8xf32>
    %353 = vector.multi_reduction <add>, %352, %cst_122 [1] : vector<8x8xf32> to vector<8xf32>
    %354 = vector.shape_cast %353 : vector<8xf32> to vector<8x1xf32>
    %355 = vector.broadcast %354 : vector<8x1xf32> to vector<8x8xf32>
    %356 = arith.divf %352, %355 : vector<8x8xf32>
    %357 = arith.truncf %356 : vector<8x8xf32> to vector<8x8xbf16>
    %358 = arith.truncf %340 : vector<8x16xf32> to vector<8x16xbf16>
    %cst_123 = arith.constant dense<0.000000e+00> : vector<8x16xf32>
    %359 = tpu.matmul %357, %358, %cst_123 {dimension_numbers = #tpu.dot_dimension_numbers<[1], [0], [0], [1], [0, 0, 1, 1], [], []>} : vector<8x8xbf16>, vector<8x16xbf16>, vector<8x16xf32> -> vector<8x16xf32>
    %360 = tpu.concatenate %337, %359 in 1 : vector<8x16xf32>, vector<8x16xf32> -> vector<8x32xf32>
    %361 = tpu.concatenate %314, %360 in 0 : vector<8x32xf32>, vector<8x32xf32> -> vector<16x32xf32>
    %c1_124 = arith.constant 1 : index
    %c0_125 = arith.constant 0 : index
    %c0_126 = arith.constant 0 : index
    %362 = vector.load %arg12[%c1_124, %c0_125, %c0_126] : memref<2x32x32xbf16, #tpu.memory_space<vmem>>, vector<1x32x32xbf16>
    %363 = vector.shape_cast %362 : vector<1x32x32xbf16> to vector<32x32xbf16>
    %364 = arith.truncf %361 : vector<16x32xf32> to vector<16x32xbf16>
    %cst_127 = arith.constant dense<0.000000e+00> : vector<16x32xf32>
    %365 = tpu.matmul %364, %363, %cst_127 {dimension_numbers = #tpu.dot_dimension_numbers<[1], [0], [0], [1], [0, 0, 1, 1], [], []>} : vector<16x32xbf16>, vector<32x32xbf16>, vector<16x32xf32> -> vector<16x32xf32>
    %c1_128 = arith.constant 1 : index
    %c0_129 = arith.constant 0 : index
    %c0_130 = arith.constant 0 : index
    %366 = vector.load %arg13[%c1_128, %c0_129, %c0_130] : memref<2x1x32xf32, #tpu.memory_space<vmem>>, vector<1x1x32xf32>
    %367 = vector.shape_cast %366 : vector<1x1x32xf32> to vector<1x32xf32>
    %368 = vector.broadcast %367 : vector<1x32xf32> to vector<16x32xf32>
    %369 = arith.addf %365, %368 : vector<16x32xf32>
    %370 = arith.addf %369, %260 : vector<16x32xf32>
    %c1_131 = arith.constant 1 : index
    %c0_132 = arith.constant 0 : index
    %c0_133 = arith.constant 0 : index
    %371 = vector.load %arg14[%c1_131, %c0_132, %c0_133] : memref<2x1x32xf32, #tpu.memory_space<vmem>>, vector<1x1x32xf32>
    %372 = vector.shape_cast %371 : vector<1x1x32xf32> to vector<1x32xf32>
    %c1_134 = arith.constant 1 : index
    %c0_135 = arith.constant 0 : index
    %c0_136 = arith.constant 0 : index
    %373 = vector.load %arg15[%c1_134, %c0_135, %c0_136] : memref<2x1x32xf32, #tpu.memory_space<vmem>>, vector<1x1x32xf32>
    %374 = vector.shape_cast %373 : vector<1x1x32xf32> to vector<1x32xf32>
    %cst_137 = arith.constant dense<0.000000e+00> : vector<16xf32>
    %375 = vector.multi_reduction <add>, %370, %cst_137 [1] : vector<16x32xf32> to vector<16xf32>
    %376 = vector.shape_cast %375 : vector<16xf32> to vector<16x1xf32>
    %cst_138 = arith.constant 3.200000e+01 : f32
    %377 = vector.broadcast %cst_138 : f32 to vector<16x1xf32>
    %378 = arith.divf %376, %377 : vector<16x1xf32>
    %379 = vector.broadcast %378 : vector<16x1xf32> to vector<16x32xf32>
    %380 = arith.subf %370, %379 : vector<16x32xf32>
    %381 = vector.broadcast %378 : vector<16x1xf32> to vector<16x32xf32>
    %382 = arith.subf %370, %381 : vector<16x32xf32>
    %383 = arith.mulf %380, %382 : vector<16x32xf32>
    %cst_139 = arith.constant dense<0.000000e+00> : vector<16xf32>
    %384 = vector.multi_reduction <add>, %383, %cst_139 [1] : vector<16x32xf32> to vector<16xf32>
    %385 = vector.shape_cast %384 : vector<16xf32> to vector<16x1xf32>
    %cst_140 = arith.constant 3.200000e+01 : f32
    %386 = vector.broadcast %cst_140 : f32 to vector<16x1xf32>
    %387 = arith.divf %385, %386 : vector<16x1xf32>
    %388 = vector.broadcast %378 : vector<16x1xf32> to vector<16x32xf32>
    %389 = arith.subf %370, %388 : vector<16x32xf32>
    %cst_141 = arith.constant 9.99999996E-13 : f32
    %390 = vector.broadcast %cst_141 : f32 to vector<16x1xf32>
    %391 = arith.addf %387, %390 : vector<16x1xf32>
    %392 = math.rsqrt %391 : vector<16x1xf32>
    %393 = vector.broadcast %392 : vector<16x1xf32> to vector<16x32xf32>
    %394 = arith.mulf %389, %393 : vector<16x32xf32>
    %395 = vector.broadcast %372 : vector<1x32xf32> to vector<16x32xf32>
    %396 = arith.mulf %394, %395 : vector<16x32xf32>
    %397 = vector.broadcast %374 : vector<1x32xf32> to vector<16x32xf32>
    %398 = arith.addf %396, %397 : vector<16x32xf32>
    %c1_142 = arith.constant 1 : index
    %c0_143 = arith.constant 0 : index
    %c0_144 = arith.constant 0 : index
    %399 = vector.load %arg16[%c1_142, %c0_143, %c0_144] : memref<2x32x64xbf16, #tpu.memory_space<vmem>>, vector<1x32x64xbf16>
    %400 = vector.shape_cast %399 : vector<1x32x64xbf16> to vector<32x64xbf16>
    %401 = arith.truncf %398 : vector<16x32xf32> to vector<16x32xbf16>
    %cst_145 = arith.constant dense<0.000000e+00> : vector<16x64xf32>
    %402 = tpu.matmul %401, %400, %cst_145 {dimension_numbers = #tpu.dot_dimension_numbers<[1], [0], [0], [1], [0, 0, 1, 1], [], []>} : vector<16x32xbf16>, vector<32x64xbf16>, vector<16x64xf32> -> vector<16x64xf32>
    %c1_146 = arith.constant 1 : index
    %c0_147 = arith.constant 0 : index
    %c0_148 = arith.constant 0 : index
    %403 = vector.load %arg17[%c1_146, %c0_147, %c0_148] : memref<2x1x64xf32, #tpu.memory_space<vmem>>, vector<1x1x64xf32>
    %404 = vector.shape_cast %403 : vector<1x1x64xf32> to vector<1x64xf32>
    %405 = vector.broadcast %404 : vector<1x64xf32> to vector<16x64xf32>
    %406 = arith.addf %402, %405 : vector<16x64xf32>
    %cst_149 = arith.constant 5.000000e-01 : f32
    %407 = vector.broadcast %cst_149 : f32 to vector<16x64xf32>
    %408 = arith.mulf %407, %406 : vector<16x64xf32>
    %cst_150 = arith.constant 0.707106769 : f32
    %409 = vector.broadcast %cst_150 : f32 to vector<16x64xf32>
    %410 = arith.mulf %406, %409 : vector<16x64xf32>
    %411 = math.erf %410 : vector<16x64xf32>
    %cst_151 = arith.constant 1.000000e+00 : f32
    %412 = vector.broadcast %cst_151 : f32 to vector<16x64xf32>
    %413 = arith.addf %412, %411 : vector<16x64xf32>
    %414 = arith.mulf %408, %413 : vector<16x64xf32>
    %c1_152 = arith.constant 1 : index
    %c0_153 = arith.constant 0 : index
    %c0_154 = arith.constant 0 : index
    %415 = vector.load %arg18[%c1_152, %c0_153, %c0_154] : memref<2x64x32xbf16, #tpu.memory_space<vmem>>, vector<1x64x32xbf16>
    %416 = vector.shape_cast %415 : vector<1x64x32xbf16> to vector<64x32xbf16>
    %417 = arith.truncf %414 : vector<16x64xf32> to vector<16x64xbf16>
    %cst_155 = arith.constant dense<0.000000e+00> : vector<16x32xf32>
    %418 = tpu.matmul %417, %416, %cst_155 {dimension_numbers = #tpu.dot_dimension_numbers<[1], [0], [0], [1], [0, 0, 1, 1], [], []>} : vector<16x64xbf16>, vector<64x32xbf16>, vector<16x32xf32> -> vector<16x32xf32>
    %c1_156 = arith.constant 1 : index
    %c0_157 = arith.constant 0 : index
    %c0_158 = arith.constant 0 : index
    %419 = vector.load %arg19[%c1_156, %c0_157, %c0_158] : memref<2x1x32xf32, #tpu.memory_space<vmem>>, vector<1x1x32xf32>
    %420 = vector.shape_cast %419 : vector<1x1x32xf32> to vector<1x32xf32>
    %421 = vector.broadcast %420 : vector<1x32xf32> to vector<16x32xf32>
    %422 = arith.addf %418, %421 : vector<16x32xf32>
    %423 = arith.addf %422, %398 : vector<16x32xf32>
    %c1_159 = arith.constant 1 : index
    %c0_160 = arith.constant 0 : index
    %c0_161 = arith.constant 0 : index
    %424 = vector.load %arg20[%c1_159, %c0_160, %c0_161] : memref<2x1x32xf32, #tpu.memory_space<vmem>>, vector<1x1x32xf32>
    %425 = vector.shape_cast %424 : vector<1x1x32xf32> to vector<1x32xf32>
    %c1_162 = arith.constant 1 : index
    %c0_163 = arith.constant 0 : index
    %c0_164 = arith.constant 0 : index
    %426 = vector.load %arg21[%c1_162, %c0_163, %c0_164] : memref<2x1x32xf32, #tpu.memory_space<vmem>>, vector<1x1x32xf32>
    %427 = vector.shape_cast %426 : vector<1x1x32xf32> to vector<1x32xf32>
    %cst_165 = arith.constant dense<0.000000e+00> : vector<16xf32>
    %428 = vector.multi_reduction <add>, %423, %cst_165 [1] : vector<16x32xf32> to vector<16xf32>
    %429 = vector.shape_cast %428 : vector<16xf32> to vector<16x1xf32>
    %cst_166 = arith.constant 3.200000e+01 : f32
    %430 = vector.broadcast %cst_166 : f32 to vector<16x1xf32>
    %431 = arith.divf %429, %430 : vector<16x1xf32>
    %432 = vector.broadcast %431 : vector<16x1xf32> to vector<16x32xf32>
    %433 = arith.subf %423, %432 : vector<16x32xf32>
    %434 = vector.broadcast %431 : vector<16x1xf32> to vector<16x32xf32>
    %435 = arith.subf %423, %434 : vector<16x32xf32>
    %436 = arith.mulf %433, %435 : vector<16x32xf32>
    %cst_167 = arith.constant dense<0.000000e+00> : vector<16xf32>
    %437 = vector.multi_reduction <add>, %436, %cst_167 [1] : vector<16x32xf32> to vector<16xf32>
    %438 = vector.shape_cast %437 : vector<16xf32> to vector<16x1xf32>
    %cst_168 = arith.constant 3.200000e+01 : f32
    %439 = vector.broadcast %cst_168 : f32 to vector<16x1xf32>
    %440 = arith.divf %438, %439 : vector<16x1xf32>
    %441 = vector.broadcast %431 : vector<16x1xf32> to vector<16x32xf32>
    %442 = arith.subf %423, %441 : vector<16x32xf32>
    %cst_169 = arith.constant 9.99999996E-13 : f32
    %443 = vector.broadcast %cst_169 : f32 to vector<16x1xf32>
    %444 = arith.addf %440, %443 : vector<16x1xf32>
    %445 = math.rsqrt %444 : vector<16x1xf32>
    %446 = vector.broadcast %445 : vector<16x1xf32> to vector<16x32xf32>
    %447 = arith.mulf %442, %446 : vector<16x32xf32>
    %448 = vector.broadcast %425 : vector<1x32xf32> to vector<16x32xf32>
    %449 = arith.mulf %447, %448 : vector<16x32xf32>
    %450 = vector.broadcast %427 : vector<1x32xf32> to vector<16x32xf32>
    %451 = arith.addf %449, %450 : vector<16x32xf32>
    %452 = vector.extract_strided_slice %451 {offsets = [0, 0], sizes = [1, 32], strides = [1, 1]} : vector<16x32xf32> to vector<1x32xf32>
    %453 = vector.extract_strided_slice %451 {offsets = [8, 0], sizes = [1, 32], strides = [1, 1]} : vector<16x32xf32> to vector<1x32xf32>
    %454 = tpu.concatenate %452, %453 in 0 : vector<1x32xf32>, vector<1x32xf32> -> vector<2x32xf32>
    %c0_170 = arith.constant 0 : index
    %c0_171 = arith.constant 0 : index
    %455 = vector.load %arg22[%c0_170, %c0_171] : memref<32x32xbf16, #tpu.memory_space<vmem>>, vector<32x32xbf16>
    %456 = arith.truncf %454 : vector<2x32xf32> to vector<2x32xbf16>
    %cst_172 = arith.constant dense<0.000000e+00> : vector<2x32xf32>
    %457 = tpu.matmul %456, %455, %cst_172 {dimension_numbers = #tpu.dot_dimension_numbers<[1], [0], [0], [1], [0, 0, 1, 1], [], []>} : vector<2x32xbf16>, vector<32x32xbf16>, vector<2x32xf32> -> vector<2x32xf32>
    %c0_173 = arith.constant 0 : index
    %c0_174 = arith.constant 0 : index
    %458 = vector.load %arg23[%c0_173, %c0_174] : memref<1x32xf32, #tpu.memory_space<vmem>>, vector<1x32xf32>
    %459 = vector.broadcast %458 : vector<1x32xf32> to vector<2x32xf32>
    %460 = arith.addf %457, %459 : vector<2x32xf32>
    %461 = math.tanh %460 : vector<2x32xf32>
    %c0_175 = arith.constant 0 : index
    %c0_176 = arith.constant 0 : index
    %462 = vector.load %arg24[%c0_175, %c0_176] : memref<32x2xbf16, #tpu.memory_space<vmem>>, vector<32x2xbf16>
    %463 = arith.truncf %461 : vector<2x32xf32> to vector<2x32xbf16>
    %cst_177 = arith.constant dense<0.000000e+00> : vector<2x2xf32>
    %464 = tpu.matmul %463, %462, %cst_177 {dimension_numbers = #tpu.dot_dimension_numbers<[1], [0], [0], [1], [0, 0, 1, 1], [], []>} : vector<2x32xbf16>, vector<32x2xbf16>, vector<2x2xf32> -> vector<2x2xf32>
    %c0_178 = arith.constant 0 : index
    %c0_179 = arith.constant 0 : index
    %465 = vector.load %arg25[%c0_178, %c0_179] : memref<1x2xf32, #tpu.memory_space<vmem>>, vector<1x2xf32>
    %466 = vector.broadcast %465 : vector<1x2xf32> to vector<2x2xf32>
    %467 = arith.addf %464, %466 : vector<2x2xf32>
    %c0_180 = arith.constant 0 : index
    %c0_181 = arith.constant 0 : index
    %468 = vector.load %arg4[%c0_180, %c0_181] : memref<2x1xi32, #tpu.memory_space<vmem>>, vector<2x1xi32>
    %469 = tpu.iota {dimensions = array<i32: 1>} : vector<2x2xi32>
    %470 = vector.broadcast %468 : vector<2x1xi32> to vector<2x2xi32>
    %471 = arith.cmpi eq, %470, %469 : vector<2x2xi32>
    %472 = arith.extui %471 : vector<2x2xi1> to vector<2x2xi32>
    %473 = arith.sitofp %472 : vector<2x2xi32> to vector<2x2xf32>
    %cst_182 = arith.constant dense<0xFF800000> : vector<2xf32>
    %474 = vector.multi_reduction <maximumf>, %467, %cst_182 [1] : vector<2x2xf32> to vector<2xf32>
    %475 = vector.shape_cast %474 : vector<2xf32> to vector<2x1xf32>
    %476 = vector.broadcast %475 : vector<2x1xf32> to vector<2x2xf32>
    %477 = arith.subf %467, %476 : vector<2x2xf32>
    %478 = math.exp %477 : vector<2x2xf32>
    %cst_183 = arith.constant dense<0.000000e+00> : vector<2xf32>
    %479 = vector.multi_reduction <add>, %478, %cst_183 [1] : vector<2x2xf32> to vector<2xf32>
    %480 = vector.shape_cast %479 : vector<2xf32> to vector<2x1xf32>
    %481 = math.log %480 : vector<2x1xf32>
    %482 = vector.broadcast %481 : vector<2x1xf32> to vector<2x2xf32>
    %483 = arith.subf %477, %482 : vector<2x2xf32>
    %484 = arith.mulf %473, %483 : vector<2x2xf32>
    %cst_184 = arith.constant dense<0.000000e+00> : vector<2xf32>
    %485 = vector.multi_reduction <add>, %484, %cst_184 [1] : vector<2x2xf32> to vector<2xf32>
    %486 = vector.shape_cast %485 : vector<2xf32> to vector<2x1xf32>
    %cst_185 = arith.constant 0.000000e+00 : f32
    %487 = vector.broadcast %cst_185 : f32 to vector<2x1xf32>
    %488 = arith.subf %487, %486 : vector<2x1xf32>
    %cst_186 = arith.constant dense<0.000000e+00> : vector<1xf32>
    %489 = vector.multi_reduction <add>, %488, %cst_186 [0] : vector<2x1xf32> to vector<1xf32>
    %490 = vector.shape_cast %489 : vector<1xf32> to vector<1x1xf32>
    %cst_187 = arith.constant 2.000000e+00 : f32
    %491 = vector.broadcast %cst_187 : f32 to vector<1x1xf32>
    %492 = arith.divf %490, %491 : vector<1x1xf32>
    %c0_188 = arith.constant 0 : index
    %c0_189 = arith.constant 0 : index
    %493 = vector.load %arg26[%c0_188, %c0_189] : memref<1x1xf32, #tpu.memory_space<vmem>>, vector<1x1xf32>
    tpu.vector_store %arg26[%c0_188, %c0_189], %492 {strides = array<i32>} : memref<1x1xf32, #tpu.memory_space<vmem>>, vector<1x1xf32>,
    return
  }
  func.func @transform_0(%arg0: i32) -> (i32, i32) {
    %c0_i32 = arith.constant 0 : i32
    %c0_i32_0 = arith.constant 0 : i32
    %c0_i32_1 = arith.constant 0 : i32
    return %c0_i32, %c0_i32_0 : i32, i32
  }
  func.func @transform_1(%arg0: i32) -> (i32, i32) {
    %c0_i32 = arith.constant 0 : i32
    %c0_i32_0 = arith.constant 0 : i32
    %c0_i32_1 = arith.constant 0 : i32
    return %c0_i32, %c0_i32_0 : i32, i32
  }
  func.func @transform_2(%arg0: i32) -> (i32, i32) {
    %c0_i32 = arith.constant 0 : i32
    %c0_i32_0 = arith.constant 0 : i32
    %c0_i32_1 = arith.constant 0 : i32
    return %c0_i32, %c0_i32_0 : i32, i32
  }
  func.func @transform_3(%arg0: i32) -> (i32, i32) {
    %c0_i32 = arith.constant 0 : i32
    %c0_i32_0 = arith.constant 0 : i32
    %c0_i32_1 = arith.constant 0 : i32
    return %c0_i32, %c0_i32_0 : i32, i32
  }
  func.func @transform_4(%arg0: i32) -> (i32, i32) {
    %c0_i32 = arith.constant 0 : i32
    %c0_i32_0 = arith.constant 0 : i32
    %c0_i32_1 = arith.constant 0 : i32
    return %c0_i32, %c0_i32_0 : i32, i32
  }
  func.func @transform_5(%arg0: i32) -> (i32, i32) {
    %c0_i32 = arith.constant 0 : i32
    %c0_i32_0 = arith.constant 0 : i32
    %c0_i32_1 = arith.constant 0 : i32
    return %c0_i32, %c0_i32_0 : i32, i32
  }
  func.func @transform_6(%arg0: i32) -> (i32, i32) {
    %c0_i32 = arith.constant 0 : i32
    %c0_i32_0 = arith.constant 0 : i32
    %c0_i32_1 = arith.constant 0 : i32
    return %c0_i32, %c0_i32_0 : i32, i32
  }
  func.func @transform_7(%arg0: i32) -> (i32, i32) {
    %c0_i32 = arith.constant 0 : i32
    %c0_i32_0 = arith.constant 0 : i32
    %c0_i32_1 = arith.constant 0 : i32
    return %c0_i32, %c0_i32_0 : i32, i32
  }
  func.func @transform_8(%arg0: i32) -> (i32, i32) {
    %c0_i32 = arith.constant 0 : i32
    %c0_i32_0 = arith.constant 0 : i32
    %c0_i32_1 = arith.constant 0 : i32
    return %c0_i32, %c0_i32_0 : i32, i32
  }
  func.func @transform_9(%arg0: i32) -> (i32, i32, i32) {
    %c0_i32 = arith.constant 0 : i32
    %c0_i32_0 = arith.constant 0 : i32
    %c0_i32_1 = arith.constant 0 : i32
    %c0_i32_2 = arith.constant 0 : i32
    return %c0_i32, %c0_i32_0, %c0_i32_1 : i32, i32, i32
  }
  func.func @transform_10(%arg0: i32) -> (i32, i32, i32) {
    %c0_i32 = arith.constant 0 : i32
    %c0_i32_0 = arith.constant 0 : i32
    %c0_i32_1 = arith.constant 0 : i32
    %c0_i32_2 = arith.constant 0 : i32
    return %c0_i32, %c0_i32_0, %c0_i32_1 : i32, i32, i32
  }
  func.func @transform_11(%arg0: i32) -> (i32, i32, i32) {
    %c0_i32 = arith.constant 0 : i32
    %c0_i32_0 = arith.constant 0 : i32
    %c0_i32_1 = arith.constant 0 : i32
    %c0_i32_2 = arith.constant 0 : i32
    return %c0_i32, %c0_i32_0, %c0_i32_1 : i32, i32, i32
  }
  func.func @transform_12(%arg0: i32) -> (i32, i32, i32) {
    %c0_i32 = arith.constant 0 : i32
    %c0_i32_0 = arith.constant 0 : i32
    %c0_i32_1 = arith.constant 0 : i32
    %c0_i32_2 = arith.constant 0 : i32
    return %c0_i32, %c0_i32_0, %c0_i32_1 : i32, i32, i32
  }
  func.func @transform_13(%arg0: i32) -> (i32, i32, i32) {
    %c0_i32 = arith.constant 0 : i32
    %c0_i32_0 = arith.constant 0 : i32
    %c0_i32_1 = arith.constant 0 : i32
    %c0_i32_2 = arith.constant 0 : i32
    return %c0_i32, %c0_i32_0, %c0_i32_1 : i32, i32, i32
  }
  func.func @transform_14(%arg0: i32) -> (i32, i32, i32) {
    %c0_i32 = arith.constant 0 : i32
    %c0_i32_0 = arith.constant 0 : i32
    %c0_i32_1 = arith.constant 0 : i32
    %c0_i32_2 = arith.constant 0 : i32
    return %c0_i32, %c0_i32_0, %c0_i32_1 : i32, i32, i32
  }
  func.func @transform_15(%arg0: i32) -> (i32, i32, i32) {
    %c0_i32 = arith.constant 0 : i32
    %c0_i32_0 = arith.constant 0 : i32
    %c0_i32_1 = arith.constant 0 : i32
    %c0_i32_2 = arith.constant 0 : i32
    return %c0_i32, %c0_i32_0, %c0_i32_1 : i32, i32, i32
  }
  func.func @transform_16(%arg0: i32) -> (i32, i32, i32) {
    %c0_i32 = arith.constant 0 : i32
    %c0_i32_0 = arith.constant 0 : i32
    %c0_i32_1 = arith.constant 0 : i32
    %c0_i32_2 = arith.constant 0 : i32
    return %c0_i32, %c0_i32_0, %c0_i32_1 : i32, i32, i32
  }
  func.func @transform_17(%arg0: i32) -> (i32, i32, i32) {
    %c0_i32 = arith.constant 0 : i32
    %c0_i32_0 = arith.constant 0 : i32
    %c0_i32_1 = arith.constant 0 : i32
    %c0_i32_2 = arith.constant 0 : i32
    return %c0_i32, %c0_i32_0, %c0_i32_1 : i32, i32, i32
  }
  func.func @transform_18(%arg0: i32) -> (i32, i32, i32) {
    %c0_i32 = arith.constant 0 : i32
    %c0_i32_0 = arith.constant 0 : i32
    %c0_i32_1 = arith.constant 0 : i32
    %c0_i32_2 = arith.constant 0 : i32
    return %c0_i32, %c0_i32_0, %c0_i32_1 : i32, i32, i32
  }
  func.func @transform_19(%arg0: i32) -> (i32, i32, i32) {
    %c0_i32 = arith.constant 0 : i32
    %c0_i32_0 = arith.constant 0 : i32
    %c0_i32_1 = arith.constant 0 : i32
    %c0_i32_2 = arith.constant 0 : i32
    return %c0_i32, %c0_i32_0, %c0_i32_1 : i32, i32, i32
  }
  func.func @transform_20(%arg0: i32) -> (i32, i32, i32) {
    %c0_i32 = arith.constant 0 : i32
    %c0_i32_0 = arith.constant 0 : i32
    %c0_i32_1 = arith.constant 0 : i32
    %c0_i32_2 = arith.constant 0 : i32
    return %c0_i32, %c0_i32_0, %c0_i32_1 : i32, i32, i32
  }
  func.func @transform_21(%arg0: i32) -> (i32, i32) {
    %c0_i32 = arith.constant 0 : i32
    %c0_i32_0 = arith.constant 0 : i32
    %c0_i32_1 = arith.constant 0 : i32
    return %c0_i32, %c0_i32_0 : i32, i32
  }
  func.func @transform_22(%arg0: i32) -> (i32, i32) {
    %c0_i32 = arith.constant 0 : i32
    %c0_i32_0 = arith.constant 0 : i32
    %c0_i32_1 = arith.constant 0 : i32
    return %c0_i32, %c0_i32_0 : i32, i32
  }
  func.func @transform_23(%arg0: i32) -> (i32, i32) {
    %c0_i32 = arith.constant 0 : i32
    %c0_i32_0 = arith.constant 0 : i32
    %c0_i32_1 = arith.constant 0 : i32
    return %c0_i32, %c0_i32_0 : i32, i32
  }
  func.func @transform_24(%arg0: i32) -> (i32, i32) {
    %c0_i32 = arith.constant 0 : i32
    %c0_i32_0 = arith.constant 0 : i32
    %c0_i32_1 = arith.constant 0 : i32
    return %c0_i32, %c0_i32_0 : i32, i32
  }
  func.func @transform_25(%arg0: i32) -> (i32, i32) {
    %c0_i32 = arith.constant 0 : i32
    %c0_i32_0 = arith.constant 0 : i32
    %c0_i32_1 = arith.constant 0 : i32
    return %c0_i32, %c0_i32_0 : i32, i32
  }
}

</mosaic_0001>

<bundles_post_ra>
// kernel: discriminator_forward.1
= control target key start
LH: loop header
LB: loop body
LE: loop exit
PB: predicated region body
PF: predicated region fallthrough
CT: control target
= control target key end

     0   :  { %s2724_s0 = inlined_call_operand.vmem [shape: s32[16,1], index: 0, kind: input, shape index: {}]   ;;  %s2725_s1 = inlined_call_operand.vmem [shape: s32[16,1], index: 1, kind: input, shape index: {}]   ;;  %s2726_s2 = inlined_call_operand.vmem [shape: f32[2,8], index: 2, kind: input, shape index: {}]   ;;  %s2727_s3 = inlined_call_operand.vmem [shape: s32[2,1], index: 3, kind: input, shape index: {}]   ;;  %s2728_s4 = inlined_call_operand.vmem [shape: bf16[128,32], index: 4, kind: input, shape index: {}]   ;;  %s2729_s5 = inlined_call_operand.vmem [shape: bf16[16,32], index: 5, kind: input, shape index: {}]   ;;  %s2730_s6 = inlined_call_operand.vmem [shape: bf16[2,32], index: 6, kind: input, shape index: {}]   ;;  %s2731_s7 = inlined_call_operand.vmem [shape: f32[1,32], index: 7, kind: input, shape index: {}]   ;;  %s2732_s8 = inlined_call_operand.vmem [shape: f32[1,32], index: 8, kind: input, shape index: {}]   ;;  %s2733_s9 = inlined_call_operand.vmem [shape: bf16[2,32,96], index: 9, kind: input, shape index: {}]   ;;  %s2734_s10 = inlined_call_operand.vmem [shape: f32[2,1,96], index: 10, kind: input, shape index: {}]   ;;  %s2735_s11 = inlined_call_operand.vmem [shape: bf16[2,32,32], index: 11, kind: input, shape index: {}]   ;;  %s2736_s12 = inlined_call_operand.vmem [shape: f32[2,1,32], index: 12, kind: input, shape index: {}]   ;;  %s2737_s13 = inlined_call_operand.vmem [shape: f32[2,1,32], index: 13, kind: input, shape index: {}]   ;;  %s2738_s14 = inlined_call_operand.vmem [shape: f32[2,1,32], index: 14, kind: input, shape index: {}]   ;;  %s2739_s15 = inlined_call_operand.vmem [shape: bf16[2,32,64], index: 15, kind: input, shape index: {}]   ;;  %s2740_s16 = inlined_call_operand.vmem [shape: f32[2,1,64], index: 16, kind: input, shape index: {}]   ;;  %s2741_s17 = inlined_call_operand.vmem [shape: bf16[2,64,32], index: 17, kind: input, shape index: {}]   ;;  %s2742_s18 = inlined_call_operand.vmem [shape: f32[2,1,32], index: 18, kind: input, shape index: {}]   ;;  %s2743_s19 = inlined_call_operand.vmem [shape: f32[2,1,32], index: 19, kind: input, shape index: {}]   ;;  %s2744_s20 = inlined_call_operand.vmem [shape: f32[2,1,32], index: 20, kind: input, shape index: {}]   ;;  %s2745_s21 = inlined_call_operand.vmem [shape: bf16[32,32], index: 21, kind: input, shape index: {}]   ;;  %s2746_s22 = inlined_call_operand.vmem [shape: f32[1,32], index: 22, kind: input, shape index: {}]   ;;  %s2747_s23 = inlined_call_operand.vmem [shape: bf16[32,2], index: 23, kind: input, shape index: {}]   ;;  %s2748_s24 = inlined_call_operand.vmem [shape: f32[1,2], index: 24, kind: input, shape index: {}]   ;;  %s2749_s25 = inlined_call_operand.hbm [shape: f32[1,1], index: 25, kind: output, shape index: {}]  }
   0x1   :  { %2755 = sst [smem:[#allocation5_spill]] %s2724_s0 }
   0x2   :  { %2756 = sst [smem:[#allocation6_spill]] %s2725_s1 }
   0x3   :  { %2757 = sst [smem:[#allocation7_spill]] %s2726_s2 }
   0x4   :  { %2758 = sst [smem:[#allocation8_spill]] %s2727_s3 }
   0x5   :  { %2759 = sst [smem:[#allocation9_spill]] %s2728_s4 }
   0x6   :  { %2760 = sst [smem:[#allocation10_spill]] %s2729_s5 }
   0x7   :  { %2761 = sst [smem:[#allocation11_spill]] %s2730_s6 }
   0x8   :  { %2762 = sst [smem:[#allocation12_spill]] %s2731_s7 }
   0x9   :  { %2763 = sst [smem:[#allocation13_spill]] %s2732_s8 }
   0xa   :  { %2764 = sst [smem:[#allocation14_spill]] %s2733_s9 }
   0xb   :  { %2765 = sst [smem:[#allocation15_spill]] %s2744_s20 }
   0xc   :  { %s2766_s6 = sld [smem:[#allocation5_spill]]  ;;  %v2139_v2 = vmov 0  }
   0xd   :  { %s2767_s20 = sld [smem:[#allocation9_spill]]  ;;  %2010 = vset.pattern.permute.xlu0 %v2139_v2  ;;  %2011 = vset.pattern.permute.xlu1 %v2139_v2 }
   0xe   :  { %2012 = vset.pattern.permute.xlu2 %v2139_v2 }
  0x12   :  { %v82_v0 = vld [vmem:[%s2766_s6] sm:$0xff]  ;;  %v83_v5 = vld [vmem:[%s2766_s6 + $0x8] sm:$0xff] }
  0x13   :  { %v1973_v1 = vld [vmem:[%s2767_s20 + $0x38] sm:$0xff]  ;;  %87 = vperm.xlu0 %2010, %v82_v0   ;;  %v1972_v3 = vld [vmem:[%s2767_s20 + $0x30] sm:$0xff]  ;;  %v1971_v4 = vld [vmem:[%s2767_s20 + $0x28] sm:$0xff] }
  0x14   :  { %203 = vmatpush.bf16.msra.mxu0 %v1973_v1 }
  0x18   :  { %204 = vmatpush.bf16.msra.mxu0 %v1972_v3 }
  0x19   :  { %30 = vsyncpa [#allocation3], 0  ;;  %v1970_v6 = vld [vmem:[%s2767_s20 + $0x20] sm:$0xff]  ;;  %v1969_v7 = vld [vmem:[%s2767_s20 + $0x18] sm:$0xff]  ;;  %s2768_s8 = sld [smem:[#allocation6_spill]]  ;;  %v84_v18 = vlaneseq  ;;  %vm221_vm9 = vcmask 261120  }
  0x1a   :  { %v1968_v8 = vld [vmem:[%s2767_s20 + $0x10] sm:$0xff]  ;;  %v1967_v9 = vld [vmem:[%s2767_s20 + $0x8] sm:$0xff]  ;;  %v1966_v10 = vld [vmem:[%s2767_s20] sm:$0xff]  ;;  %v2140_v21 = vmov 1.0|1.0   ;;  %s2769_s9 = sld [smem:[#allocation11_spill]] }
  0x1b   :  { %90 = vperm.xlu0 %2010, %v83_v5   ;;  %v2317_v19 = vand.u32 127, %v84_v18  ;;  %s2770_s29 = sld [smem:[#allocation10_spill]]  ;;  %v2141_v46 = vmov 32.0   ;;  %s2142_s5 = smov 96  }
  0x1c   :  { %205 = vmatpush.bf16.msra.mxu0 %v1971_v4  ;;  %2043 = vrcp.f32 %v2141_v46  ;;  %s2771_s30 = sld [smem:[#allocation14_spill]]  ;;  %s2143_s0 = smov 112  }
  0x1d   :  { %s2773_s20 = sld [smem:[#allocation13_spill]]  ;;  %s2144_s7 = smov 64  }
  0x1e   :  { %s2774_s6 = sld [smem:[#allocation7_spill]]  ;;  %s2145_s3 = smov 80  }
  0x1f   :  { %v117_v11 = vld [vmem:[%s2768_s8] sm:$0xff]  ;;  %v118_v13 = vld [vmem:[%s2768_s8 + $0x8] sm:$0xff]  ;;  %s2772_s8 = sld [smem:[#allocation12_spill]]  ;;  %s2146_s26 = smov 48  }
  0x20   :  { %206 = vmatpush.bf16.msra.mxu0 %v1970_v6  ;;  %vm121_vm0 = vcmp.eq.s32.totalorder %v117_v11, 0  ;;  %vm138_vm1 = vcmp.eq.s32.totalorder %v117_v11, 1  ;;  %vm122_vm2 = vcmp.eq.s32.totalorder %v118_v13, 0  ;;  %vm139_vm3 = vcmp.eq.s32.totalorder %v118_v13, 1  ;;  %v119_v22 = vld [vmem:[%s2769_s9] sm:$0x1] }
  0x21   :  { %v123_v12 = vsel %vm121_vm0, 1, %v2139_v2  ;;  %v140_v14 = vsel %vm138_vm1, 1, %v2139_v2  ;;  %v124_v15 = vsel %vm122_vm2, 1, %v2139_v2  ;;  %v141_v16 = vsel %vm139_vm3, 1, %v2139_v2  ;;  %v115_v28 = vld [vmem:[%s2770_s29] sm:$0xf] }
  0x22   :  { %126 = vperm.xlu1 %2011, %v123_v12   ;;  %143 = vperm.xlu2 %2012, %v140_v14   ;;  %v120_v23 = vunpack.c.l.bf16 %v119_v22  ;;  %v116_v31 = vunpack.c.l.bf16 %v115_v28  ;;  %v2044_v47 = vpop.eup %2043  ;;  %v1975_v63 = vld [vmem:[%s2771_s30 + $0x8] sm:$0xff]  ;;  %v1974_v1 = vld [vmem:[%s2771_s30] sm:$0xff]  ;;  %vm328_vm3 = vcmask 130048   ;;  %s2147_s27 = smov 16   ;;  %s2775_s29 = sld [smem:[#allocation15_spill]] }
  0x23   :  { %v229_v48 = vmul.f32 32.0, %v2044_v47  ;;  %vm233_vm12 = vweird.f32 %v2044_v47  ;;  %316 = vmatpush.bf16.msra.mxu1 %v1975_v63  ;;  %s1766_s9 = sshll.u32 %s2749_s25, 4  ;;  %s1767_s9 = int_to_ptr.hbm [resolvable:$true] %s1766_s9 }
  0x24   :  { %207 = vmatpush.bf16.msra.mxu0 %v1969_v7  ;;  %v150_v26 = vperm.slane %v120_v23, 1  ;;  %v133_v27 = vperm.slane %v120_v23, 0 }
  0x25   :  { %v230_v49 = vsub.f32 1.0, %v229_v48 }
  0x27   :  { %v231_v50 = vmul.f32 %v2044_v47, %v230_v49  ;;  %317 = vmatpush.bf16.msra.mxu1 %v1974_v1 }
  0x28   :  { %208 = vmatpush.bf16.msra.mxu0 %v1968_v8 }
  0x29   :  { %v232_v51 = vadd.f32 %v2044_v47, %v231_v50 }
  0x2a   :  { %129 = vperm.xlu1 %2011, %v124_v15   ;;  %146 = vperm.xlu2 %2012, %v141_v16  }
  0x2b   :  { %v2329_v52 = vsel %vm233_vm12, %v2044_v47, %v232_v51 }
  0x2c   :  { %209 = vmatpush.bf16.msra.mxu0 %v1967_v9 }
  0x30   :  { %210 = vmatpush.bf16.msra.mxu0 %v1966_v10 }
  0x7c   :  { %v144_v24 = vpop.permute.xlu2 %143 }
  0x7d   :  { %vm148_vm7 = vcmp.eq.s32.totalorder %v144_v24, 1 }
  0x7e   :  { %v151_v29 = vsel %vm148_vm7, %v150_v26, 0.0 }
  0x84   :  { %v147_v33 = vpop.permute.xlu2 %146 }
  0x85   :  { %v88_v17 = vpop.permute.xlu0 %87  ;;  %vm149_vm10 = vcmp.eq.s32.totalorder %v147_v33, 1 }
  0x86   :  { %vm92_vm4 = vcmp.eq.s32.totalorder %v88_v17, %v2317_v19  ;;  %v152_v39 = vsel %vm149_vm10, %v150_v26, 0.0  ;;  %v2024_v26 = vld [vmem:[%s2773_s20] ss:$0 sm:$0xff] }
  0x8d   :  { %v91_v20 = vpop.permute.xlu0 %90 }
  0x8e   :  { %vm93_vm5 = vcmp.eq.s32.totalorder %v91_v20, %v2317_v19 }
  0x8f   :  { %vm1809_vm6 = vmpackc.low %vm93_vm5, %vm92_vm4  ;;  %vm351_vm4 = vcmask 64512   ;;  %vm382_vm5 = vcmask 1043456  }
  0x90   :  { %1810 = vmatmul.msk.bf16.vlgmr.msra.gmra.mxu0 %vm1809_vm6, %v2140_v21  ;;  %v2023_v21 = vld [vmem:[%s2772_s8] ss:$0 sm:$0xff] }
  0x94   :  { %v127_v25 = vpop.permute.xlu1 %126 }
  0x95   :  { %vm131_vm8 = vcmp.eq.s32.totalorder %v127_v25, 1 }
  0x96   :  { %v134_v30 = vsel %vm131_vm8, %v133_v27, 0.0 }
  0x97   :  { %v153_v32 = vadd.f32 %v151_v29, %v134_v30 }
  0x9c   :  { %v130_v34 = vpop.permute.xlu1 %129 }
  0x9d   :  { %vm132_vm11 = vcmp.eq.s32.totalorder %v130_v34, 1 }
  0x9e   :  { %v135_v40 = vsel %vm132_vm11, %v133_v27, 0.0 }
  0x9f   :  { %v154_v42 = vadd.f32 %v152_v39, %v135_v40 }
 0x10d   :  { %v212_v35 = vpop.f32.mrf.mxu0 }
 0x10e   :  { %v213_v36 = vadd.f32 %v212_v35, %v116_v31 }
 0x110   :  { %v217_v37 = vadd.f32 %v213_v36, %v153_v32 }
 0x112   :  { %v222_v38 = vsel %vm221_vm9, %v217_v37, 0.0 }
 0x113   :  { %223 = vadd.xlane.f32.xlu0 %v222_v38 }
 0x115   :  { %v214_v41 = vpop.f32.mrf.mxu0 }
 0x116   :  { %v215_v43 = vadd.f32 %v214_v41, %v116_v31  ;;  %v2025_v31 = vld [vmem:[%s2734_s10] ss:$0 sm:$0xff] }
 0x118   :  { %v218_v44 = vadd.f32 %v215_v43, %v154_v42 }
 0x11a   :  { %v225_v45 = vsel %vm221_vm9, %v218_v44, 0.0 }
 0x11b   :  { %226 = vadd.xlane.f32.xlu1 %v225_v45 }
 0x186   :  { %v224_v53 = vpop.xlane.xlu0 %223 }
 0x187   :  { %v235_v54 = vmul.f32 %v2329_v52, %v224_v53 }
 0x189   :  { %v237_v55 = vsub.f32 %v217_v37, %v235_v54  ;;  %v283_v37 = vld [vmem:[%s2774_s6] sm:$0x3] }
 0x18a   :  { %v284_v38 = vsub.f32 1.0, %v283_v37 }
 0x18b   :  { %v239_v56 = vmul.f32 %v237_v55, %v237_v55 }
 0x18c   :  { %v2366_v39 = vmul.f32 -1e+09, %v284_v38 }
 0x18d   :  { %v241_v57 = vsel %vm221_vm9, %v239_v56, 0.0 }
 0x18e   :  { %v227_v58 = vpop.xlane.xlu1 %226  ;;  %242 = vadd.xlane.f32.xlu2 %v241_v57  ;;  %v2369_v40 = vperm.slane %v2366_v39, 0 }
 0x18f   :  { %v236_v59 = vmul.f32 %v2329_v52, %v227_v58 }
 0x191   :  { %v238_v60 = vsub.f32 %v218_v44, %v236_v59 }
 0x193   :  { %v240_v61 = vmul.f32 %v238_v60, %v238_v60 }
 0x195   :  { %v244_v62 = vsel %vm221_vm9, %v240_v61, 0.0 }
 0x196   :  { %245 = vadd.xlane.f32.xlu2 %v244_v62 }
 0x201   :  { %v243_v0 = vpop.xlane.xlu2 %242 }
 0x202   :  { %v247_v2 = vmul.f32 %v243_v0, %v2329_v52 }
 0x204   :  { %v249_v3 = vadd.f32 1e-12, %v247_v2 }
 0x206   :  { %2045 = vrsqrt.f32 %v249_v3  ;;  %vm257_vm14 = vweird.f32 %v249_v3 }
 0x209   :  { %v246_v4 = vpop.xlane.xlu2 %245 }
 0x20a   :  { %v248_v5 = vmul.f32 %v246_v4, %v2329_v52 }
 0x20c   :  { %v2046_v6 = vpop.eup %2045  ;;  %v250_v7 = vadd.f32 1e-12, %v248_v5 }
 0x20d   :  { %v252_v8 = vmul.f32 %v2046_v6, %v249_v3  ;;  %vm258_vm13 = vweird.f32 %v2046_v6 }
 0x20e   :  { %2047 = vrsqrt.f32 %v250_v7  ;;  %vm259_vm15 = vmor %vm257_vm14, %vm258_vm13  ;;  %vm267_vm1 = vweird.f32 %v250_v7 }
 0x20f   :  { %v253_v9 = vmul.f32 %v2046_v6, %v252_v8 }
 0x211   :  { %v254_v10 = vmul.f32 0.5, %v253_v9 }
 0x213   :  { %v255_v11 = vsub.f32 1.5, %v254_v10 }
 0x214   :  { %v2048_v12 = vpop.eup %2047 }
 0x215   :  { %v256_v13 = vmul.f32 %v2046_v6, %v255_v11  ;;  %v262_v14 = vmul.f32 %v2048_v12, %v250_v7  ;;  %vm268_vm0 = vweird.f32 %v2048_v12 }
 0x216   :  { %vm269_vm2 = vmor %vm267_vm1, %vm268_vm0 }
 0x217   :  { %v263_v15 = vmul.f32 %v2048_v12, %v262_v14  ;;  %v260_v16 = vsel %vm259_vm15, %v2046_v6, %v256_v13 }
 0x218   :  { %v271_v20 = vmul.f32 %v260_v16, %v237_v55 }
 0x219   :  { %v264_v17 = vmul.f32 0.5, %v263_v15 }
 0x21a   :  { %v276_v25 = vmul.f32 %v2023_v21, %v271_v20 }
 0x21b   :  { %v265_v18 = vsub.f32 1.5, %v264_v17 }
 0x21c   :  { %v2349_v28 = vadd.f32 %v2024_v26, %v276_v25 }
 0x21d   :  { %v266_v22 = vmul.f32 %v2048_v12, %v265_v18 }
 0x21f   :  { %v270_v23 = vsel %vm269_vm2, %v2048_v12, %v266_v22 }
 0x220   :  { %v272_v24 = vmul.f32 %v270_v23, %v238_v60 }
 0x222   :  { %v277_v27 = vmul.f32 %v2023_v21, %v272_v24  ;;  %v2399_v24 = vperm.slane %v2366_v39, 1 }
 0x224   :  { %v2351_v29 = vadd.f32 %v2024_v26, %v277_v27 }
 0x226   :  { %v290_v30 = vpack.c.bf16 %v2351_v29, %v2349_v28 }
 0x228   :  { %1819 = vmatmul.msk.bf16.vlgmr.msra.gmra.mxu1 %vm221_vm9, %v290_v30 }
 0x2a5   :  { %v319_v32 = vpop.f32.mrf.mxu1 }
 0x2a6   :  { %v320_v33 = vadd.f32 %v2025_v31, %v319_v32 }
 0x2a8   :  { %v324_v34 = vpack.c.bf16 %v320_v33, %v320_v33 }
 0x2aa   :  { %326 = vrot.lane.b32.xlu0 %v324_v34, %s2142_s5 }
 0x2ad   :  { %v321_v54 = vpop.f32.mrf.mxu1 }
 0x2ae   :  { %v322_v55 = vadd.f32 %v2025_v31, %v321_v54 }
 0x2b0   :  { %v2378_v56 = vpack.c.bf16 %v322_v55, %v322_v55 }
 0x2b2   :  { %399 = vrot.lane.b32.xlu0 %v324_v34, %s2143_s0 }
 0x31c   :  { %v327_v35 = vpop.permute.xlu0 %326 }
 0x31d   :  { %v333_v36 = vsel %vm328_vm3, %v327_v35, 0 }
 0x31e   :  { %342 = vmatpush.bf16.xpose.msra.mxu2 %v333_v36 }
 0x324   :  { %v400_v13 = vpop.permute.xlu0 %399 }
 0x325   :  { %1820 = vmatmul.msk.bf16.vlgmr.msra.gmra.mxu2 %vm328_vm3, %v324_v34 }
 0x3a8   :  { %v344_v41 = vpop.f32.mrf.mxu2 }
 0x3a9   :  { %v348_v42 = vmul.f32 0.25, %v344_v41 }
 0x3ab   :  { %v350_v43 = vadd.f32 %v2369_v40, %v348_v42 }
 0x3ad   :  { %v352_v44 = vsel %vm351_vm4, %v350_v43, -inf }
 0x3ae   :  { %353 = vmax.xlane.f32.xlu1 %v352_v44 }
 0x3b0   :  { %v346_v45 = vpop.f32.mrf.mxu2 }
 0x3c7   :  { %377 = vrot.lane.b32.xlu1 %v324_v34, %s2144_s7 }
 0x421   :  { %v354_v46 = vpop.xlane.xlu1 %353 }
 0x422   :  { %v355_v47 = vsub.f32 %v350_v43, %v354_v46 }
 0x424   :  { %v356_v48 = vmul.f32 1.442695, %v355_v47 }
 0x426   :  { %2049 = vpow2.f32 %v356_v48 }
 0x42c   :  { %v2050_v49 = vpop.eup %2049 }
 0x42d   :  { %v358_v50 = vsel %vm351_vm4, %v2050_v49, 0.0 }
 0x42e   :  { %359 = vadd.xlane.f32.xlu2 %v358_v50 }
 0x439   :  { %v378_v51 = vpop.permute.xlu1 %377 }
 0x43a   :  { %v384_v53 = vsel %vm382_vm5, %v378_v51, 0 }
 0x43b   :  { %393 = vmatpush.bf16.msra.mxu3 %v384_v53 }
 0x446   :  { %401 = vrot.lane.b32.xlu2 %v324_v34, %s2145_s3 }
 0x44e   :  { %449 = vrot.lane.b32.xlu2 %v324_v34, %s2146_s26 }
 0x456   :  { %549 = vrot.lane.b32.xlu2 %v2378_v56, %s2145_s3 }
 0x45e   :  { %547 = vrot.lane.b32.xlu2 %v2378_v56, %s2143_s0 }
 0x466   :  { %477 = vrot.lane.b32.xlu2 %v2378_v56, %s2142_s5 }
 0x4a1   :  { %v360_v57 = vpop.xlane.xlu2 %359 }
 0x4a2   :  { %2051 = vrcp.f32 %v360_v57  ;;  %v372_v63 = vand.u32 2147483648, %v360_v57  ;;  %v370_v1 = vand.u32 2147483647, %v360_v57  ;;  %vm366_vm7 = vweird.f32 %v360_v57 }
 0x4a4   :  { %v373_v3 = vor.u32 1.1754944e-38, %v372_v63  ;;  %vm371_vm10 = vcmp.eq.f32.partialorder %v370_v1, 8.507059e+37 }
 0x4a8   :  { %v2052_v58 = vpop.eup %2051 }
 0x4a9   :  { %v362_v59 = vmul.f32 %v2052_v58, %v360_v57  ;;  %v402_v60 = vpop.permute.xlu2 %401  ;;  %vm367_vm6 = vweird.f32 %v2052_v58 }
 0x4aa   :  { %v407_v61 = vsel %vm328_vm3, %v402_v60, 0  ;;  %vm368_vm8 = vmor %vm366_vm7, %vm367_vm6 }
 0x4ab   :  { %v363_v62 = vsub.f32 1.0, %v362_v59  ;;  %416 = vmatpush.bf16.xpose.msrb.mxu3 %v407_v61 }
 0x4ad   :  { %v364_v0 = vmul.f32 %v2052_v58, %v363_v62 }
 0x4af   :  { %v365_v2 = vadd.f32 %v2052_v58, %v364_v0 }
 0x4b1   :  { %v450_v4 = vpop.permute.xlu2 %449  ;;  %v369_v5 = vsel %vm368_vm8, %v2052_v58, %v365_v2 }
 0x4b2   :  { %v455_v6 = vsel %vm382_vm5, %v450_v4, 0  ;;  %v374_v7 = vsel %vm371_vm10, %v373_v3, %v369_v5 }
 0x4b3   :  { %464 = vmatpush.bf16.msrb.mxu1 %v455_v6  ;;  %v375_v8 = vmul.f32 %v2050_v49, %v374_v7 }
 0x4b5   :  { %v376_v9 = vpack.c.bf16 %v375_v8, %v375_v8 }
 0x4b7   :  { %1821 = vmatmul.msk.bf16.vlgmr.msra.gmra.mxu3 %vm351_vm4, %v376_v9 }
 0x4b9   :  { %v550_v10 = vpop.permute.xlu2 %549 }
 0x4ba   :  { %v555_v11 = vsel %vm328_vm3, %v550_v10, 0 }
 0x4bb   :  { %564 = vmatpush.bf16.xpose.msra.mxu1 %v555_v11 }
 0x4c1   :  { %v548_v12 = vpop.permute.xlu2 %547 }
 0x4c7   :  { %1822 = vmatmul.msk.bf16.vlgmr.msrb.gmra.mxu3 %vm328_vm3, %v400_v13 }
 0x4c9   :  { %v478_v14 = vpop.permute.xlu2 %477 }
 0x4ca   :  { %v483_v15 = vsel %vm328_vm3, %v478_v14, 0 }
 0x4cb   :  { %492 = vmatpush.bf16.xpose.msrb.mxu2 %v483_v15 }
 0x4d2   :  { %1824 = vmatmul.msk.bf16.vlgmr.msrb.gmra.mxu2 %vm328_vm3, %v2378_v56 }
 0x53a   :  { %v2394_v16 = vpop.f32.mrf.mxu3 }
 0x542   :  { %v397_v17 = vpop.f32.mrf.mxu3 }
 0x54a   :  { %v418_v18 = vpop.f32.mrf.mxu3 }
 0x54b   :  { %v422_v20 = vmul.f32 0.25, %v418_v18 }
 0x54d   :  { %v423_v21 = vadd.f32 %v422_v20, %v2369_v40 }
 0x54f   :  { %v424_v22 = vsel %vm351_vm4, %v423_v21, -inf }
 0x550   :  { %425 = vmax.xlane.f32.xlu0 %v424_v22 }
 0x552   :  { %v420_v23 = vpop.f32.mrf.mxu3 }
 0x555   :  { %v494_v25 = vpop.f32.mrf.mxu2 }
 0x556   :  { %v498_v26 = vmul.f32 0.25, %v494_v25 }
 0x558   :  { %v500_v27 = vadd.f32 %v2399_v24, %v498_v26 }
 0x55a   :  { %v501_v30 = vsel %vm351_vm4, %v500_v27, -inf }
 0x55b   :  { %502 = vmax.xlane.f32.xlu2 %v501_v30 }
 0x55d   :  { %v496_v31 = vpop.f32.mrf.mxu2 }
 0x5c3   :  { %v426_v32 = vpop.xlane.xlu0 %425 }
 0x5c4   :  { %v427_v33 = vsub.f32 %v423_v21, %v426_v32 }
 0x5c6   :  { %v428_v34 = vmul.f32 1.442695, %v427_v33 }
 0x5c8   :  { %2053 = vpow2.f32 %v428_v34 }
 0x5ce   :  { %v2054_v35 = vpop.eup %2053  ;;  %v503_v60 = vpop.xlane.xlu2 %502 }
 0x5cf   :  { %v430_v36 = vsel %vm351_vm4, %v2054_v35, 0.0  ;;  %v504_v63 = vsub.f32 %v500_v27, %v503_v60 }
 0x5d0   :  { %431 = vadd.xlane.f32.xlu1 %v430_v36 }
 0x5d1   :  { %v505_v1 = vmul.f32 1.442695, %v504_v63 }
 0x643   :  { %v432_v37 = vpop.xlane.xlu1 %431 }
 0x644   :  { %2055 = vrcp.f32 %v432_v37  ;;  %v444_v42 = vand.u32 2147483648, %v432_v37  ;;  %v442_v44 = vand.u32 2147483647, %v432_v37  ;;  %vm438_vm12 = vweird.f32 %v432_v37 }
 0x646   :  { %v445_v46 = vor.u32 1.1754944e-38, %v444_v42  ;;  %vm443_vm14 = vcmp.eq.f32.partialorder %v442_v44, 8.507059e+37 }
 0x64a   :  { %v2056_v38 = vpop.eup %2055 }
 0x64b   :  { %v434_v39 = vmul.f32 %v2056_v38, %v432_v37  ;;  %vm439_vm11 = vweird.f32 %v2056_v38 }
 0x64c   :  { %vm440_vm13 = vmor %vm438_vm12, %vm439_vm11 }
 0x64d   :  { %v435_v41 = vsub.f32 1.0, %v434_v39 }
 0x64f   :  { %v436_v43 = vmul.f32 %v2056_v38, %v435_v41  ;;  %v1977_v41 = vld [vmem:[%s2735_s11 + $0x8] sm:$0xff] }
 0x650   :  { %653 = vmatpush.bf16.msrb.mxu0 %v1977_v41 }
 0x651   :  { %v437_v45 = vadd.f32 %v2056_v38, %v436_v43 }
 0x653   :  { %v441_v47 = vsel %vm440_vm13, %v2056_v38, %v437_v45 }
 0x654   :  { %v446_v48 = vsel %vm443_vm14, %v445_v46, %v441_v47  ;;  %v1976_v47 = vld [vmem:[%s2735_s11] sm:$0xff] }
 0x655   :  { %v447_v49 = vmul.f32 %v2054_v35, %v446_v48  ;;  %654 = vmatpush.bf16.msrb.mxu0 %v1976_v47 }
 0x657   :  { %v448_v50 = vpack.c.bf16 %v447_v49, %v447_v49 }
 0x659   :  { %1823 = vmatmul.msk.bf16.vlgmr.msrb.gmra.mxu1 %vm351_vm4, %v448_v50 }
 0x669   :  { %1826 = vmatmul.msk.bf16.vlgmr.msra.gmra.mxu1 %vm328_vm3, %v548_v12 }
 0x6d6   :  { %v2406_v51 = vpop.f32.mrf.mxu1 }
 0x6de   :  { %v468_v53 = vpop.f32.mrf.mxu1 }
 0x6e6   :  { %v566_v54 = vpop.f32.mrf.mxu1 }
 0x6e7   :  { %v570_v55 = vmul.f32 0.25, %v566_v54 }
 0x6e9   :  { %v571_v57 = vadd.f32 %v570_v55, %v2399_v24  ;;  %v2026_v55 = vld [vmem:[%s2736_s12] ss:$0 sm:$0xff] }
 0x6eb   :  { %v572_v58 = vsel %vm351_vm4, %v571_v57, -inf }
 0x6ec   :  { %573 = vmax.xlane.f32.xlu0 %v572_v58 }
 0x6ee   :  { %v568_v59 = vpop.f32.mrf.mxu1 }
 0x700   :  { %597 = vrot.lane.b32.xlu0 %v2378_v56, %s2146_s26 }
 0x75f   :  { %v574_v61 = vpop.xlane.xlu0 %573 }
 0x760   :  { %v575_v62 = vsub.f32 %v571_v57, %v574_v61 }
 0x762   :  { %v576_v0 = vmul.f32 1.442695, %v575_v62 }
 0x764   :  { %2057 = vpow2.f32 %v576_v0 }
 0x765   :  { %2059 = vpow2.f32 %v505_v1 }
 0x76a   :  { %v2058_v2 = vpop.eup %2057 }
 0x76b   :  { %v578_v3 = vsel %vm351_vm4, %v2058_v2, 0.0  ;;  %v2060_v4 = vpop.eup %2059 }
 0x76c   :  { %579 = vadd.xlane.f32.xlu1 %v578_v3  ;;  %v507_v7 = vsel %vm351_vm4, %v2060_v4, 0.0 }
 0x772   :  { %v598_v5 = vpop.permute.xlu0 %597 }
 0x773   :  { %v603_v6 = vsel %vm382_vm5, %v598_v5, 0 }
 0x774   :  { %508 = vadd.xlane.f32.xlu1 %v507_v7  ;;  %612 = vmatpush.bf16.msra.mxu2 %v603_v6 }
 0x78d   :  { %526 = vrot.lane.b32.xlu1 %v2378_v56, %s2144_s7 }
 0x7df   :  { %v580_v8 = vpop.xlane.xlu1 %579 }
 0x7e0   :  { %2061 = vrcp.f32 %v580_v8  ;;  %v592_v13 = vand.u32 2147483648, %v580_v8  ;;  %v590_v15 = vand.u32 2147483647, %v580_v8  ;;  %vm586_vm0 = vweird.f32 %v580_v8 }
 0x7e2   :  { %v593_v20 = vor.u32 1.1754944e-38, %v592_v13  ;;  %vm591_vm2 = vcmp.eq.f32.partialorder %v590_v15, 8.507059e+37 }
 0x7e6   :  { %v2062_v9 = vpop.eup %2061 }
 0x7e7   :  { %v582_v10 = vmul.f32 %v2062_v9, %v580_v8  ;;  %v509_v11 = vpop.xlane.xlu1 %508  ;;  %vm587_vm15 = vweird.f32 %v2062_v9 }
 0x7e8   :  { %2063 = vrcp.f32 %v509_v11  ;;  %vm588_vm1 = vmor %vm586_vm0, %vm587_vm15  ;;  %v521_v31 = vand.u32 2147483648, %v509_v11  ;;  %vm515_vm7 = vweird.f32 %v509_v11  ;;  %v519_v32 = vand.u32 2147483647, %v509_v11 }
 0x7e9   :  { %v583_v12 = vsub.f32 1.0, %v582_v10 }
 0x7ea   :  { %v522_v34 = vor.u32 1.1754944e-38, %v521_v31  ;;  %vm520_vm10 = vcmp.eq.f32.partialorder %v519_v32, 8.507059e+37  ;;  %v2027_v32 = vld [vmem:[%s2737_s13] ss:$0 sm:$0xff] }
 0x7eb   :  { %v584_v14 = vmul.f32 %v2062_v9, %v583_v12 }
 0x7ed   :  { %v585_v17 = vadd.f32 %v2062_v9, %v584_v14 }
 0x7ee   :  { %v2064_v18 = vpop.eup %2063 }
 0x7ef   :  { %v589_v21 = vsel %vm588_vm1, %v2062_v9, %v585_v17  ;;  %v511_v22 = vmul.f32 %v2064_v18, %v509_v11  ;;  %vm516_vm6 = vweird.f32 %v2064_v18  ;;  %v1978_v11 = vld [vmem:[%s2739_s15] sm:$0xff] }
 0x7f0   :  { %v594_v56 = vsel %vm591_vm2, %v593_v20, %v589_v21  ;;  %vm517_vm8 = vmor %vm515_vm7, %vm516_vm6 }
 0x7f1   :  { %v595_v23 = vmul.f32 %v2058_v2, %v594_v56  ;;  %v512_v25 = vsub.f32 1.0, %v511_v22 }
 0x7f3   :  { %v513_v26 = vmul.f32 %v2064_v18, %v512_v25  ;;  %v596_v27 = vpack.c.bf16 %v595_v23, %v595_v23 }
 0x7f5   :  { %v514_v30 = vadd.f32 %v2064_v18, %v513_v26  ;;  %1827 = vmatmul.msk.bf16.vlgmr.msra.gmra.mxu2 %vm351_vm4, %v596_v27 }
 0x7f7   :  { %v518_v33 = vsel %vm517_vm8, %v2064_v18, %v514_v30 }
 0x7f8   :  { %v523_v35 = vsel %vm520_vm10, %v522_v34, %v518_v33 }
 0x7f9   :  { %v524_v36 = vmul.f32 %v2060_v4, %v523_v35 }
 0x7fb   :  { %v525_v39 = vpack.c.bf16 %v524_v36, %v524_v36  ;;  %v2028_v36 = vld [vmem:[%s2738_s14] ss:$0 sm:$0xff] }
 0x7ff   :  { %v527_v37 = vpop.permute.xlu1 %526 }
 0x800   :  { %v532_v38 = vsel %vm382_vm5, %v527_v37, 0 }
 0x801   :  { %541 = vmatpush.bf16.msra.mxu3 %v532_v38 }
 0x804   :  { %1825 = vmatmul.msk.bf16.vlgmr.msra.gmra.mxu3 %vm351_vm4, %v525_v39 }
 0x878   :  { %v614_v42 = vpop.f32.mrf.mxu2 }
 0x879   :  { %v2013_v43 = vpack.i.bf16 %v614_v42, %v2406_v51 }
 0x87b   :  { %2014 = vrot.lane.b32.xlu0 %v2013_v43, %s2147_s27 }
 0x880   :  { %v616_v44 = vpop.f32.mrf.mxu2 }
 0x881   :  { %v2029_v44 = vld [vmem:[%s2740_s16] ss:$0 sm:$0xff] }
 0x887   :  { %v543_v45 = vpop.f32.mrf.mxu3 }
 0x88f   :  { %v545_v46 = vpop.f32.mrf.mxu3 }
 0x8ed   :  { %v2015_v48 = vpop.permute.xlu0 %2014 }
 0x8ee   :  { %v2017_v49 = vunpack.i.h.bf16 %v2015_v48  ;;  %v2016_v50 = vunpack.i.l.bf16 %v2015_v48 }
 0x8f0   :  { %v474_v53 = vsel %vm328_vm3, %v2394_v16, %v2016_v50  ;;  %v622_v54 = vsel %vm328_vm3, %v543_v45, %v2017_v49 }
 0x8f1   :  { %v627_v51 = vpack.c.bf16 %v622_v54, %v474_v53 }
 0x8f3   :  { %1836 = vmatmul.msk.bf16.vlgmr.msrb.gmra.mxu0 %vm221_vm9, %v627_v51 }
 0x970   :  { %v656_v57 = vpop.f32.mrf.mxu0 }
 0x971   :  { %v657_v58 = vadd.f32 %v2026_v55, %v656_v57 }
 0x973   :  { %v661_v59 = vadd.f32 %v657_v58, %v2349_v28 }
 0x975   :  { %v665_v60 = vsel %vm221_vm9, %v661_v59, 0.0 }
 0x976   :  { %666 = vadd.xlane.f32.xlu0 %v665_v60 }
 0x978   :  { %v658_v61 = vpop.f32.mrf.mxu0 }
 0x979   :  { %v659_v62 = vadd.f32 %v2026_v55, %v658_v61 }
 0x97b   :  { %v662_v16 = vadd.f32 %v659_v62, %v2351_v29  ;;  %v1979_v29 = vld [vmem:[%s2739_s15 + $0x8] sm:$0xff] }
 0x97c   :  { %749 = vmatpush.bf16.msrb.mxu3 %v1979_v29 }
 0x97d   :  { %v668_v63 = vsel %vm221_vm9, %v662_v16, 0.0 }
 0x97e   :  { %669 = vadd.xlane.f32.xlu2 %v668_v63 }
 0x980   :  { %750 = vmatpush.bf16.msrb.mxu3 %v1978_v11 }
 0x9e9   :  { %v667_v0 = vpop.xlane.xlu0 %666 }
 0x9ea   :  { %v671_v1 = vmul.f32 %v667_v0, %v2329_v52  ;;  %v1983_v0 = vld [vmem:[%s2741_s17 + $0x18] sm:$0xff] }
 0x9eb   :  { %890 = vmatpush.bf16.msrb.mxu1 %v1983_v0 }
 0x9ec   :  { %v673_v2 = vsub.f32 %v661_v59, %v671_v1 }
 0x9ee   :  { %v675_v3 = vmul.f32 %v673_v2, %v673_v2 }
 0x9f0   :  { %v677_v4 = vsel %vm221_vm9, %v675_v3, 0.0 }
 0x9f1   :  { %v670_v5 = vpop.xlane.xlu2 %669  ;;  %678 = vadd.xlane.f32.xlu1 %v677_v4 }
 0x9f2   :  { %v672_v28 = vmul.f32 %v670_v5, %v2329_v52 }
 0x9f4   :  { %v674_v6 = vsub.f32 %v662_v16, %v672_v28 }
 0x9f6   :  { %v676_v7 = vmul.f32 %v674_v6, %v674_v6 }
 0x9f8   :  { %v680_v8 = vsel %vm221_vm9, %v676_v7, 0.0  ;;  %v1982_v7 = vld [vmem:[%s2741_s17 + $0x10] sm:$0xff] }
 0x9f9   :  { %681 = vadd.xlane.f32.xlu2 %v680_v8  ;;  %891 = vmatpush.bf16.msrb.mxu1 %v1982_v7 }
 0xa64   :  { %v679_v9 = vpop.xlane.xlu1 %678 }
 0xa65   :  { %v683_v10 = vmul.f32 %v679_v9, %v2329_v52 }
 0xa67   :  { %v685_v12 = vadd.f32 1e-12, %v683_v10 }
 0xa69   :  { %2065 = vrsqrt.f32 %v685_v12  ;;  %vm693_vm12 = vweird.f32 %v685_v12 }
 0xa6c   :  { %v682_v13 = vpop.xlane.xlu2 %681 }
 0xa6d   :  { %v684_v14 = vmul.f32 %v682_v13, %v2329_v52 }
 0xa6f   :  { %v2066_v15 = vpop.eup %2065  ;;  %v686_v17 = vadd.f32 1e-12, %v684_v14  ;;  %v1981_v14 = vld [vmem:[%s2741_s17 + $0x8] sm:$0xff] }
 0xa70   :  { %v688_v18 = vmul.f32 %v2066_v15, %v685_v12  ;;  %vm694_vm11 = vweird.f32 %v2066_v15  ;;  %892 = vmatpush.bf16.msrb.mxu1 %v1981_v14 }
 0xa71   :  { %2067 = vrsqrt.f32 %v686_v17  ;;  %vm695_vm13 = vmor %vm693_vm12, %vm694_vm11  ;;  %vm703_vm15 = vweird.f32 %v686_v17 }
 0xa72   :  { %v689_v20 = vmul.f32 %v2066_v15, %v688_v18 }
 0xa74   :  { %v690_v21 = vmul.f32 0.5, %v689_v20 }
 0xa76   :  { %v691_v22 = vsub.f32 1.5, %v690_v21 }
 0xa77   :  { %v2068_v56 = vpop.eup %2067 }
 0xa78   :  { %v692_v23 = vmul.f32 %v2066_v15, %v691_v22  ;;  %v698_v25 = vmul.f32 %v2068_v56, %v686_v17  ;;  %vm704_vm14 = vweird.f32 %v2068_v56  ;;  %v1980_v22 = vld [vmem:[%s2741_s17] sm:$0xff] }
 0xa79   :  { %vm705_vm0 = vmor %vm703_vm15, %vm704_vm14  ;;  %893 = vmatpush.bf16.msrb.mxu1 %v1980_v22 }
 0xa7a   :  { %v699_v26 = vmul.f32 %v2068_v56, %v698_v25  ;;  %v696_v27 = vsel %vm695_vm13, %v2066_v15, %v692_v23  ;;  %vm882_vm13 = vcmask 523264  }
 0xa7b   :  { %v707_v33 = vmul.f32 %v696_v27, %v673_v2 }
 0xa7c   :  { %v700_v30 = vmul.f32 0.5, %v699_v26 }
 0xa7d   :  { %v712_v37 = vmul.f32 %v2027_v32, %v707_v33 }
 0xa7e   :  { %v701_v31 = vsub.f32 1.5, %v700_v30 }
 0xa7f   :  { %v2457_v41 = vadd.f32 %v2028_v36, %v712_v37 }
 0xa80   :  { %v702_v34 = vmul.f32 %v2068_v56, %v701_v31 }
 0xa82   :  { %v706_v35 = vsel %vm705_vm0, %v2068_v56, %v702_v34 }
 0xa83   :  { %v708_v38 = vmul.f32 %v706_v35, %v674_v6 }
 0xa85   :  { %v713_v39 = vmul.f32 %v2027_v32, %v708_v38 }
 0xa87   :  { %v2459_v42 = vadd.f32 %v2028_v36, %v713_v39 }
 0xa89   :  { %v723_v43 = vpack.c.bf16 %v2459_v42, %v2457_v41 }
 0xa8b   :  { %1845 = vmatmul.msk.bf16.vlgmr.msrb.gmra.mxu3 %vm221_vm9, %v723_v43 }
 0xb0e   :  { %v752_v45 = vpop.f32.mrf.mxu3 }
 0xb0f   :  { %v2467_v46 = vadd.f32 %v2029_v44, %v752_v45 }
 0xb11   :  { %v2470_v47 = vmul.f32 0.70710677, %v2467_v46  ;;  %v757_v7 = vmul.f32 0.5, %v2467_v46 }
 0xb13   :  { %v761_v48 = vmul.f32 %v2470_v47, %v2470_v47 }
 0xb15   :  { %v762_v49 = vmin.f32 %v761_v48, 16.0 }
 0xb16   :  { %v754_v50 = vpop.f32.mrf.mxu3 }
 0xb17   :  { %v763_v53 = vmul.f32 2.1237322e-06, %v762_v49  ;;  %v774_v54 = vmul.f32 3.8918573e-05, %v762_v49  ;;  %v2474_v51 = vadd.f32 %v2029_v44, %v754_v50 }
 0xb19   :  { %v764_v55 = vadd.f32 0.00028619796, %v763_v53  ;;  %v775_v57 = vadd.f32 0.001143296, %v774_v54  ;;  %v2477_v58 = vmul.f32 0.70710677, %v2474_v51 }
 0xb1b   :  { %v776_v59 = vmul.f32 %v775_v57, %v762_v49  ;;  %v801_v60 = vmul.f32 %v2477_v58, %v2477_v58  ;;  %v765_v61 = vmul.f32 %v764_v55, %v762_v49 }
 0xb1d   :  { %v777_v62 = vadd.f32 0.014752088, %v776_v59  ;;  %v802_v16 = vmin.f32 %v801_v60, 16.0  ;;  %v766_v3 = vadd.f32 0.0036580483, %v765_v61 }
 0xb1f   :  { %v778_v63 = vmul.f32 %v777_v62, %v762_v49  ;;  %v803_v1 = vmul.f32 2.1237322e-06, %v802_v16  ;;  %v814_v2 = vmul.f32 3.8918573e-05, %v802_v16  ;;  %v767_v9 = vmul.f32 %v766_v3, %v762_v49 }
 0xb21   :  { %v779_v4 = vadd.f32 0.112945676, %v778_v63  ;;  %v804_v5 = vadd.f32 0.00028619796, %v803_v1  ;;  %v815_v28 = vadd.f32 0.001143296, %v814_v2 }
 0xb22   :  { %v768_v17 = vadd.f32 0.05243302, %v767_v9 }
 0xb23   :  { %v780_v6 = vmul.f32 %v779_v4, %v762_v49  ;;  %v805_v8 = vmul.f32 %v804_v5, %v802_v16  ;;  %v816_v29 = vmul.f32 %v815_v28, %v802_v16 }
 0xb24   :  { %v769_v23 = vmul.f32 %v768_v17, %v762_v49 }
 0xb25   :  { %v781_v10 = vadd.f32 0.4994258, %v780_v6  ;;  %v806_v11 = vadd.f32 0.0036580483, %v805_v8  ;;  %v817_v12 = vadd.f32 0.014752088, %v816_v29 }
 0xb26   :  { %v770_v31 = vadd.f32 0.18741608, %v769_v23  ;;  %v758_v8 = vmul.f32 0.5, %v2474_v51 }
 0xb27   :  { %v782_v13 = vmul.f32 %v781_v10, %v762_v49  ;;  %v818_v15 = vmul.f32 %v817_v12, %v802_v16  ;;  %v807_v20 = vmul.f32 %v806_v11, %v802_v16 }
 0xb28   :  { %v771_v36 = vmul.f32 %v770_v31, %v762_v49 }
 0xb29   :  { %v783_v18 = vadd.f32 1.0, %v782_v13  ;;  %v819_v21 = vadd.f32 0.112945676, %v818_v15  ;;  %v808_v25 = vadd.f32 0.05243302, %v807_v20 }
 0xb2a   :  { %v772_v45 = vadd.f32 1.1283791, %v771_v36 }
 0xb2b   :  { %2069 = vrcp.f32 %v783_v18  ;;  %v820_v56 = vmul.f32 %v819_v21, %v802_v16  ;;  %v809_v33 = vmul.f32 %v808_v25, %v802_v16  ;;  %v795_v38 = vand.u32 2147483648, %v783_v18 }
 0xb2c   :  { %v793_v43 = vand.u32 2147483647, %v783_v18  ;;  %vm789_vm2 = vweird.f32 %v783_v18  ;;  %v773_v59 = vmul.f32 %v772_v45, %v2470_v47 }
 0xb2d   :  { %v821_v26 = vadd.f32 0.4994258, %v820_v56  ;;  %v810_v39 = vadd.f32 0.18741608, %v809_v33  ;;  %v796_v53 = vor.u32 1.1754944e-38, %v795_v38 }
 0xb2e   :  { %vm794_vm7 = vcmp.eq.f32.partialorder %v793_v43, 8.507059e+37 }
 0xb2f   :  { %v822_v27 = vmul.f32 %v821_v26, %v802_v16  ;;  %v811_v54 = vmul.f32 %v810_v39, %v802_v16 }
 0xb31   :  { %v2070_v30 = vpop.eup %2069  ;;  %v823_v34 = vadd.f32 1.0, %v822_v27  ;;  %v812_v49 = vadd.f32 1.1283791, %v811_v54 }
 0xb32   :  { %v785_v32 = vmul.f32 %v2070_v30, %v783_v18  ;;  %vm790_vm1 = vweird.f32 %v2070_v30 }
 0xb33   :  { %2071 = vrcp.f32 %v823_v34  ;;  %vm791_vm6 = vmor %vm789_vm2, %vm790_vm1  ;;  %v835_v61 = vand.u32 2147483648, %v823_v34  ;;  %v833_v0 = vand.u32 2147483647, %v823_v34  ;;  %vm829_vm10 = vweird.f32 %v823_v34 }
 0xb34   :  { %v786_v35 = vsub.f32 1.0, %v785_v32  ;;  %v813_v4 = vmul.f32 %v812_v49, %v2477_v58  ;;  %v2030_v58 = vld [vmem:[%s2742_s18] ss:$0 sm:$0xff] }
 0xb35   :  { %v836_v2 = vor.u32 1.1754944e-38, %v835_v61  ;;  %vm834_vm12 = vcmp.eq.f32.partialorder %v833_v0, 8.507059e+37 }
 0xb36   :  { %v787_v37 = vmul.f32 %v2070_v30, %v786_v35 }
 0xb38   :  { %v788_v44 = vadd.f32 %v2070_v30, %v787_v37 }
 0xb39   :  { %v2072_v48 = vpop.eup %2071 }
 0xb3a   :  { %v792_v50 = vsel %vm791_vm6, %v2070_v30, %v788_v44  ;;  %v825_v55 = vmul.f32 %v2072_v48, %v823_v34  ;;  %vm830_vm8 = vweird.f32 %v2072_v48  ;;  %v1984_v34 = vld [vmem:[%s2771_s30 + $0x10] sm:$0xff] }
 0xb3b   :  { %v797_v57 = vsel %vm794_vm7, %v796_v53, %v792_v50  ;;  %vm831_vm11 = vmor %vm829_vm10, %vm830_vm8 }
 0xb3c   :  { %v826_v60 = vsub.f32 1.0, %v825_v55  ;;  %v798_v62 = vmul.f32 %v797_v57, %v773_v59 }
 0xb3e   :  { %v827_v63 = vmul.f32 %v2072_v48, %v826_v60  ;;  %v1846_v3 = vclamps-f32 %v798_v62, 1.0  ;;  %v2031_v60 = vld [vmem:[%s2743_s19] ss:$0 sm:$0xff] }
 0xb40   :  { %v828_v1 = vadd.f32 %v2072_v48, %v827_v63  ;;  %v841_v6 = vadd.f32 1.0, %v1846_v3  ;;  %v2032_v63 = vld [vmem:[%s2775_s29] ss:$0 sm:$0xff] }
 0xb42   :  { %v832_v16 = vsel %vm831_vm11, %v2072_v48, %v828_v1  ;;  %v843_v9 = vmul.f32 %v841_v6, %v757_v7 }
 0xb43   :  { %v837_v5 = vsel %vm834_vm12, %v836_v2, %v832_v16 }
 0xb44   :  { %v838_v28 = vmul.f32 %v837_v5, %v813_v4  ;;  %v2033_v5 = vld [vmem:[%s2734_s10 + $0x1] ss:$0 sm:$0xff] }
 0xb46   :  { %v1847_v47 = vclamps-f32 %v838_v28, 1.0 }
 0xb48   :  { %v842_v29 = vadd.f32 1.0, %v1847_v47 }
 0xb4a   :  { %v844_v10 = vmul.f32 %v842_v29, %v758_v8 }
 0xb4c   :  { %v853_v11 = vpack.c.bf16 %v844_v10, %v843_v9 }
 0xb4e   :  { %1864 = vmatmul.msk.bf16.vlgmr.msrb.gmra.mxu1 %vm882_vm13, %v853_v11 }
 0xbcb   :  { %v895_v12 = vpop.f32.mrf.mxu1 }
 0xbcc   :  { %v896_v13 = vadd.f32 %v2030_v58, %v895_v12 }
 0xbce   :  { %v900_v14 = vadd.f32 %v896_v13, %v2457_v41 }
 0xbd0   :  { %v904_v15 = vsel %vm221_vm9, %v900_v14, 0.0 }
 0xbd1   :  { %905 = vadd.xlane.f32.xlu2 %v904_v15 }
 0xbd3   :  { %v897_v46 = vpop.f32.mrf.mxu1 }
 0xbd4   :  { %v898_v51 = vadd.f32 %v2030_v58, %v897_v46 }
 0xbd6   :  { %v901_v17 = vadd.f32 %v898_v51, %v2459_v42  ;;  %v1985_v42 = vld [vmem:[%s2771_s30 + $0x18] sm:$0xff] }
 0xbd7   :  { %990 = vmatpush.bf16.msrb.mxu2 %v1985_v42 }
 0xbd8   :  { %v907_v18 = vsel %vm221_vm9, %v901_v17, 0.0 }
 0xbd9   :  { %908 = vadd.xlane.f32.xlu2 %v907_v18 }
 0xbdb   :  { %991 = vmatpush.bf16.msrb.mxu2 %v1984_v34 }
 0xc44   :  { %v906_v20 = vpop.xlane.xlu2 %905 }
 0xc45   :  { %v910_v21 = vmul.f32 %v906_v20, %v2329_v52 }
 0xc47   :  { %v912_v22 = vsub.f32 %v900_v14, %v910_v21 }
 0xc49   :  { %v914_v56 = vmul.f32 %v912_v22, %v912_v22 }
 0xc4b   :  { %v916_v23 = vsel %vm221_vm9, %v914_v56, 0.0 }
 0xc4c   :  { %917 = vadd.xlane.f32.xlu2 %v916_v23  ;;  %v909_v25 = vpop.xlane.xlu2 %908 }
 0xc4d   :  { %v911_v41 = vmul.f32 %v909_v25, %v2329_v52 }
 0xc4f   :  { %v913_v26 = vsub.f32 %v901_v17, %v911_v41 }
 0xc51   :  { %v915_v27 = vmul.f32 %v913_v26, %v913_v26 }
 0xc53   :  { %v919_v30 = vsel %vm221_vm9, %v915_v27, 0.0 }
 0xc54   :  { %920 = vadd.xlane.f32.xlu0 %v919_v30 }
 0xcbf   :  { %v918_v31 = vpop.xlane.xlu2 %917 }
 0xcc0   :  { %v922_v32 = vmul.f32 %v918_v31, %v2329_v52 }
 0xcc2   :  { %v924_v33 = vadd.f32 1e-12, %v922_v32 }
 0xcc4   :  { %2073 = vrsqrt.f32 %v924_v33  ;;  %vm932_vm15 = vweird.f32 %v924_v33 }
 0xcc7   :  { %v921_v35 = vpop.xlane.xlu0 %920 }
 0xcc8   :  { %v923_v36 = vmul.f32 %v921_v35, %v2329_v52 }
 0xcca   :  { %v2074_v37 = vpop.eup %2073  ;;  %v925_v38 = vadd.f32 1e-12, %v923_v36 }
 0xccb   :  { %v927_v39 = vmul.f32 %v2074_v37, %v924_v33  ;;  %vm933_vm14 = vweird.f32 %v2074_v37 }
 0xccc   :  { %2075 = vrsqrt.f32 %v925_v38  ;;  %vm934_vm0 = vmor %vm932_vm15, %vm933_vm14  ;;  %vm942_vm2 = vweird.f32 %v925_v38 }
 0xccd   :  { %v928_v43 = vmul.f32 %v2074_v37, %v927_v39 }
 0xccf   :  { %v929_v44 = vmul.f32 0.5, %v928_v43 }
 0xcd1   :  { %v930_v45 = vsub.f32 1.5, %v929_v44 }
 0xcd2   :  { %v2076_v48 = vpop.eup %2075 }
 0xcd3   :  { %v931_v50 = vmul.f32 %v2074_v37, %v930_v45  ;;  %v937_v53 = vmul.f32 %v2076_v48, %v925_v38  ;;  %vm943_vm1 = vweird.f32 %v2076_v48 }
 0xcd4   :  { %vm944_vm6 = vmor %vm942_vm2, %vm943_vm1 }
 0xcd5   :  { %v938_v54 = vmul.f32 %v2076_v48, %v937_v53  ;;  %v935_v55 = vsel %vm934_vm0, %v2074_v37, %v931_v50 }
 0xcd6   :  { %v946_v49 = vmul.f32 %v935_v55, %v912_v22 }
 0xcd7   :  { %v939_v57 = vmul.f32 0.5, %v938_v54 }
 0xcd8   :  { %v951_v0 = vmul.f32 %v2031_v60, %v946_v49 }
 0xcd9   :  { %v940_v59 = vsub.f32 1.5, %v939_v57 }
 0xcda   :  { %v2523_v3 = vadd.f32 %v2032_v63, %v951_v0 }
 0xcdb   :  { %v941_v61 = vmul.f32 %v2076_v48, %v940_v59 }
 0xcdd   :  { %v945_v62 = vsel %vm944_vm6, %v2076_v48, %v941_v61 }
 0xcde   :  { %v947_v1 = vmul.f32 %v945_v62, %v913_v26 }
 0xce0   :  { %v952_v2 = vmul.f32 %v2031_v60, %v947_v1 }
 0xce2   :  { %v2525_v4 = vadd.f32 %v2032_v63, %v952_v2 }
 0xce4   :  { %v963_v16 = vpack.c.bf16 %v2525_v4, %v2523_v3 }
 0xce6   :  { %1878 = vmatmul.msk.bf16.vlgmr.msrb.gmra.mxu2 %vm221_vm9, %v963_v16 }
 0xd69   :  { %v993_v28 = vpop.f32.mrf.mxu2 }
 0xd6a   :  { %v994_v6 = vadd.f32 %v2033_v5, %v993_v28 }
 0xd6c   :  { %v2533_v47 = vpack.c.bf16 %v994_v6, %v994_v6 }
 0xd6e   :  { %1069 = vrot.lane.b32.xlu0 %v2533_v47, %s2143_s0  ;;  %1071 = vrot.lane.b32.xlu2 %v2533_v47, %s2145_s3 }
 0xd71   :  { %v995_v7 = vpop.f32.mrf.mxu2 }
 0xd72   :  { %v996_v8 = vadd.f32 %v2033_v5, %v995_v7 }
 0xd74   :  { %v2539_v29 = vpack.c.bf16 %v996_v8, %v996_v8 }
 0xd76   :  { %1218 = vrot.lane.b32.xlu1 %v2539_v29, %s2145_s3  ;;  %1216 = vrot.lane.b32.xlu0 %v2539_v29, %s2143_s0  ;;  %s2776_s3 = sld [smem:[#allocation8_spill]] }
 0xd77   :  { %1000 = vrot.lane.b32.xlu2 %v2533_v47, %s2142_s5 }
 0xd7e   :  { %1147 = vrot.lane.b32.xlu1 %v2539_v29, %s2142_s5 }
 0xdc8   :  { %v1072_v9 = vpop.permute.xlu2 %1071 }
 0xdc9   :  { %v1077_v10 = vsel %vm328_vm3, %v1072_v9, 0 }
 0xdca   :  { %1086 = vmatpush.bf16.xpose.msra.mxu1 %v1077_v10 }
 0xdd1   :  { %v1001_v11 = vpop.permute.xlu2 %1000 }
 0xdd2   :  { %v1006_v58 = vsel %vm328_vm3, %v1001_v11, 0 }
 0xdd3   :  { %1015 = vmatpush.bf16.xpose.msra.mxu0 %v1006_v58 }
 0xdda   :  { %1879 = vmatmul.msk.bf16.vlgmr.msra.gmra.mxu0 %vm328_vm3, %v2533_v47 }
 0xde0   :  { %v1070_v12 = vpop.permute.xlu0 %1069 }
 0xde1   :  { %1881 = vmatmul.msk.bf16.vlgmr.msra.gmra.mxu1 %vm328_vm3, %v1070_v12 }
 0xde8   :  { %v1219_v13 = vpop.permute.xlu1 %1218  ;;  %v1217_v15 = vpop.permute.xlu0 %1216 }
 0xde9   :  { %v1224_v14 = vsel %vm328_vm3, %v1219_v13, 0 }
 0xdea   :  { %1233 = vmatpush.bf16.xpose.msrb.mxu1 %v1224_v14 }
 0xdf0   :  { %v1148_v46 = vpop.permute.xlu1 %1147 }
 0xdf1   :  { %v1153_v51 = vsel %vm328_vm3, %v1148_v46, 0  ;;  %1885 = vmatmul.msk.bf16.vlgmr.msrb.gmra.mxu1 %vm328_vm3, %v1217_v15 }
 0xdf2   :  { %1162 = vmatpush.bf16.xpose.msrb.mxu0 %v1153_v51 }
 0xdf9   :  { %1883 = vmatmul.msk.bf16.vlgmr.msrb.gmra.mxu0 %vm328_vm3, %v2539_v29 }
 0xe57   :  { %v1017_v17 = vpop.f32.mrf.mxu0 }
 0xe58   :  { %v1021_v18 = vmul.f32 0.25, %v1017_v17 }
 0xe5a   :  { %v1022_v20 = vadd.f32 %v1021_v18, %v2369_v40 }
 0xe5c   :  { %v1023_v21 = vsel %vm351_vm4, %v1022_v20, -inf }
 0xe5d   :  { %1024 = vmax.xlane.f32.xlu1 %v1023_v21 }
 0xe5e   :  { %v1088_v22 = vpop.f32.mrf.mxu1 }
 0xe5f   :  { %v1019_v56 = vpop.f32.mrf.mxu0  ;;  %v1092_v23 = vmul.f32 0.25, %v1088_v22 }
 0xe61   :  { %v1093_v25 = vadd.f32 %v1092_v23, %v2369_v40 }
 0xe63   :  { %v1094_v41 = vsel %vm351_vm4, %v1093_v25, -inf }
 0xe64   :  { %1095 = vmax.xlane.f32.xlu0 %v1094_v41 }
 0xe66   :  { %v1090_v26 = vpop.f32.mrf.mxu1 }
 0xe6e   :  { %v1235_v27 = vpop.f32.mrf.mxu1 }
 0xe6f   :  { %v1239_v30 = vmul.f32 0.25, %v1235_v27 }
 0xe71   :  { %v1240_v42 = vadd.f32 %v1239_v30, %v2399_v24 }
 0xe73   :  { %v1241_v31 = vsel %vm351_vm4, %v1240_v42, -inf }
 0xe74   :  { %1242 = vmax.xlane.f32.xlu2 %v1241_v31 }
 0xe76   :  { %v1164_v32 = vpop.f32.mrf.mxu0  ;;  %v1237_v33 = vpop.f32.mrf.mxu1 }
 0xe77   :  { %v1168_v34 = vmul.f32 0.25, %v1164_v32 }
 0xe79   :  { %v1169_v35 = vadd.f32 %v1168_v34, %v2399_v24 }
 0xe7b   :  { %v1170_v36 = vsel %vm351_vm4, %v1169_v35, -inf }
 0xe7c   :  { %1171 = vmax.xlane.f32.xlu0 %v1170_v36 }
 0xe7e   :  { %v1166_v40 = vpop.f32.mrf.mxu0 }
 0xe90   :  { %1266 = vrot.lane.b32.xlu0 %v2539_v29, %s2146_s26 }
 0xe98   :  { %1048 = vrot.lane.b32.xlu0 %v2533_v47, %s2144_s7 }
 0xed0   :  { %v1025_v45 = vpop.xlane.xlu1 %1024 }
 0xed1   :  { %v1026_v50 = vsub.f32 %v1022_v20, %v1025_v45 }
 0xed3   :  { %v1027_v54 = vmul.f32 1.442695, %v1026_v50 }
 0xed7   :  { %v1096_v37 = vpop.xlane.xlu0 %1095 }
 0xed8   :  { %v1097_v38 = vsub.f32 %v1093_v25, %v1096_v37 }
 0xeda   :  { %v1098_v39 = vmul.f32 1.442695, %v1097_v38 }
 0xedc   :  { %2077 = vpow2.f32 %v1098_v39 }
 0xee2   :  { %v2078_v43 = vpop.eup %2077 }
 0xee3   :  { %v1100_v44 = vsel %vm351_vm4, %v2078_v43, 0.0 }
 0xee4   :  { %1101 = vadd.xlane.f32.xlu2 %v1100_v44 }
 0xee7   :  { %v1243_v24 = vpop.xlane.xlu2 %1242 }
 0xee8   :  { %v1244_v48 = vsub.f32 %v1240_v42, %v1243_v24 }
 0xeea   :  { %v1245_v53 = vmul.f32 1.442695, %v1244_v48 }
 0xeec   :  { %2079 = vpow2.f32 %v1245_v53 }
 0xeed   :  { %2081 = vpow2.f32 %v1027_v54 }
 0xeef   :  { %v1172_v55 = vpop.xlane.xlu0 %1171 }
 0xef0   :  { %v1173_v59 = vsub.f32 %v1169_v35, %v1172_v55 }
 0xef2   :  { %v2572_v57 = vpop.eup %2079  ;;  %v1174_v49 = vmul.f32 1.442695, %v1173_v59 }
 0xef3   :  { %v1247_v60 = vsel %vm351_vm4, %v2572_v57, 0.0  ;;  %v2576_v61 = vpop.eup %2081 }
 0xef4   :  { %1248 = vadd.xlane.f32.xlu1 %v1247_v60  ;;  %2083 = vpow2.f32 %v1174_v49  ;;  %v1029_v62 = vsel %vm351_vm4, %v2576_v61, 0.0 }
 0xefa   :  { %v2582_v63 = vpop.eup %2083 }
 0xefb   :  { %v1176_v1 = vsel %vm351_vm4, %v2582_v63, 0.0 }
 0xefc   :  { %1119 = vrot.lane.b32.xlu2 %v2533_v47, %s2146_s26  ;;  %1030 = vadd.xlane.f32.xlu1 %v1029_v62 }
 0xf02   :  { %v1267_v0 = vpop.permute.xlu0 %1266 }
 0xf03   :  { %v1272_v8 = vsel %vm382_vm5, %v1267_v0, 0 }
 0xf04   :  { %1177 = vadd.xlane.f32.xlu1 %v1176_v1 }
 0xf0a   :  { %v1049_v2 = vpop.permute.xlu0 %1048 }
 0xf0b   :  { %v1054_v16 = vsel %vm382_vm5, %v1049_v2, 0 }
 0xf0c   :  { %1063 = vmatpush.bf16.msra.mxu3 %v1054_v16 }
 0xf1d   :  { %1195 = vrot.lane.b32.xlu1 %v2539_v29, %s2144_s7 }
 0xf57   :  { %v1102_v5 = vpop.xlane.xlu2 %1101 }
 0xf58   :  { %2085 = vrcp.f32 %v1102_v5  ;;  %v1114_v10 = vand.u32 2147483648, %v1102_v5  ;;  %v1112_v58 = vand.u32 2147483647, %v1102_v5  ;;  %vm1108_vm8 = vweird.f32 %v1102_v5 }
 0xf5a   :  { %v1115_v29 = vor.u32 1.1754944e-38, %v1114_v10  ;;  %vm1113_vm11 = vcmp.eq.f32.partialorder %v1112_v58, 8.507059e+37  ;;  %v1986_v10 = vld [vmem:[%s2735_s11 + $0x10] sm:$0xff] }
 0xf5e   :  { %v2086_v28 = vpop.eup %2085 }
 0xf5f   :  { %v1104_v6 = vmul.f32 %v2086_v28, %v1102_v5  ;;  %v1120_v47 = vpop.permute.xlu2 %1119  ;;  %vm1109_vm7 = vweird.f32 %v2086_v28 }
 0xf60   :  { %v1125_v7 = vsel %vm382_vm5, %v1120_v47, 0  ;;  %vm1110_vm10 = vmor %vm1108_vm8, %vm1109_vm7 }
 0xf61   :  { %v1105_v9 = vsub.f32 1.0, %v1104_v6  ;;  %1134 = vmatpush.bf16.msra.mxu2 %v1125_v7 }
 0xf63   :  { %v1106_v11 = vmul.f32 %v2086_v28, %v1105_v9 }
 0xf65   :  { %1281 = vmatpush.bf16.msrb.mxu2 %v1272_v8  ;;  %v1107_v12 = vadd.f32 %v2086_v28, %v1106_v11 }
 0xf67   :  { %v1111_v13 = vsel %vm1110_vm10, %v2086_v28, %v1107_v12  ;;  %v1249_v14 = vpop.xlane.xlu1 %1248  ;;  %v1987_v28 = vld [vmem:[%s2735_s11 + $0x18] sm:$0xff] }
 0xf68   :  { %v1116_v15 = vsel %vm1113_vm11, %v1115_v29, %v1111_v13  ;;  %2087 = vrcp.f32 %v1249_v14  ;;  %v1261_v22 = vand.u32 2147483648, %v1249_v14  ;;  %v1259_v23 = vand.u32 2147483647, %v1249_v14  ;;  %1324 = vmatpush.bf16.msra.mxu0 %v1987_v28 }
 0xf69   :  { %v1117_v46 = vmul.f32 %v2078_v43, %v1116_v15  ;;  %vm1255_vm14 = vweird.f32 %v1249_v14  ;;  %v2034_v15 = vld [vmem:[%s2736_s12 + $0x1] ss:$0 sm:$0xff] }
 0xf6a   :  { %v1262_v26 = vor.u32 1.1754944e-38, %v1261_v22  ;;  %vm1260_vm0 = vcmp.eq.f32.partialorder %v1259_v23, 8.507059e+37 }
 0xf6b   :  { %v1118_v51 = vpack.c.bf16 %v1117_v46, %v1117_v46 }
 0xf6c   :  { %1325 = vmatpush.bf16.msra.mxu0 %v1986_v10 }
 0xf6d   :  { %1882 = vmatmul.msk.bf16.vlgmr.msra.gmra.mxu2 %vm351_vm4, %v1118_v51 }
 0xf6e   :  { %v2088_v17 = vpop.eup %2087 }
 0xf6f   :  { %v1251_v18 = vmul.f32 %v2088_v17, %v1249_v14  ;;  %v1031_v20 = vpop.xlane.xlu1 %1030  ;;  %vm1256_vm12 = vweird.f32 %v2088_v17 }
 0xf70   :  { %2089 = vrcp.f32 %v1031_v20  ;;  %vm1257_vm15 = vmor %vm1255_vm14, %vm1256_vm12  ;;  %v1043_v34 = vand.u32 2147483648, %v1031_v20  ;;  %v1041_v36 = vand.u32 2147483647, %v1031_v20  ;;  %vm1037_vm2 = vweird.f32 %v1031_v20 }
 0xf71   :  { %v1252_v21 = vsub.f32 1.0, %v1251_v18 }
 0xf72   :  { %v1044_v39 = vor.u32 1.1754944e-38, %v1043_v34  ;;  %vm1042_vm7 = vcmp.eq.f32.partialorder %v1041_v36, 8.507059e+37  ;;  %v1988_v36 = vld [vmem:[%s2739_s15 + $0x10] sm:$0xff] }
 0xf73   :  { %v1253_v56 = vmul.f32 %v2088_v17, %v1252_v21 }
 0xf75   :  { %v1254_v25 = vadd.f32 %v2088_v17, %v1253_v56 }
 0xf76   :  { %v2090_v41 = vpop.eup %2089 }
 0xf77   :  { %v1258_v27 = vsel %vm1257_vm15, %v2088_v17, %v1254_v25  ;;  %v1033_v30 = vmul.f32 %v2090_v41, %v1031_v20  ;;  %v1178_v42 = vpop.xlane.xlu1 %1177  ;;  %vm1038_vm1 = vweird.f32 %v2090_v41 }
 0xf78   :  { %v1263_v31 = vsel %vm1260_vm0, %v1262_v26, %v1258_v27  ;;  %2091 = vrcp.f32 %v1178_v42  ;;  %vm1039_vm6 = vmor %vm1037_vm2, %vm1038_vm1  ;;  %v1190_v55 = vand.u32 2147483648, %v1178_v42  ;;  %vm1184_vm10 = vweird.f32 %v1178_v42 }
 0xf79   :  { %v1264_v32 = vmul.f32 %v2572_v57, %v1263_v31  ;;  %v1034_v33 = vsub.f32 1.0, %v1033_v30  ;;  %v1188_v57 = vand.u32 2147483647, %v1178_v42 }
 0xf7a   :  { %v1191_v60 = vor.u32 1.1754944e-38, %v1190_v55 }
 0xf7b   :  { %v1035_v35 = vmul.f32 %v2090_v41, %v1034_v33  ;;  %v1265_v40 = vpack.c.bf16 %v1264_v32, %v1264_v32  ;;  %vm1189_vm12 = vcmp.eq.f32.partialorder %v1188_v57, 8.507059e+37 }
 0xf7d   :  { %v1036_v37 = vadd.f32 %v2090_v41, %v1035_v35  ;;  %1886 = vmatmul.msk.bf16.vlgmr.msrb.gmra.mxu2 %vm351_vm4, %v1265_v40 }
 0xf7e   :  { %v2092_v38 = vpop.eup %2091 }
 0xf7f   :  { %v1040_v43 = vsel %vm1039_vm6, %v2090_v41, %v1036_v37  ;;  %v1180_v44 = vmul.f32 %v2092_v38, %v1178_v42  ;;  %vm1185_vm8 = vweird.f32 %v2092_v38 }
 0xf80   :  { %v1045_v45 = vsel %vm1042_vm7, %v1044_v39, %v1040_v43  ;;  %vm1186_vm11 = vmor %vm1184_vm10, %vm1185_vm8 }
 0xf81   :  { %v1046_v24 = vmul.f32 %v2576_v61, %v1045_v45  ;;  %v1181_v48 = vsub.f32 1.0, %v1180_v44 }
 0xf83   :  { %v1182_v50 = vmul.f32 %v2092_v38, %v1181_v48  ;;  %v1047_v53 = vpack.c.bf16 %v1046_v24, %v1046_v24 }
 0xf85   :  { %v1183_v54 = vadd.f32 %v2092_v38, %v1182_v50  ;;  %1880 = vmatmul.msk.bf16.vlgmr.msra.gmra.mxu3 %vm351_vm4, %v1047_v53 }
 0xf87   :  { %v1187_v59 = vsel %vm1186_vm11, %v2092_v38, %v1183_v54 }
 0xf88   :  { %v1192_v49 = vsel %vm1189_vm12, %v1191_v60, %v1187_v59  ;;  %v2035_v60 = vld [vmem:[%s2737_s13 + $0x1] ss:$0 sm:$0xff] }
 0xf89   :  { %v1193_v62 = vmul.f32 %v2582_v63, %v1192_v49 }
 0xf8b   :  { %v1194_v1 = vpack.c.bf16 %v1193_v62, %v1193_v62 }
 0xf8f   :  { %v1196_v0 = vpop.permute.xlu1 %1195 }
 0xf90   :  { %v1201_v61 = vsel %vm382_vm5, %v1196_v0, 0 }
 0xf91   :  { %1210 = vmatpush.bf16.msrb.mxu3 %v1201_v61  ;;  %v2036_v61 = vld [vmem:[%s2738_s14 + $0x1] ss:$0 sm:$0xff] }
 0xf95   :  { %1884 = vmatmul.msk.bf16.vlgmr.msrb.gmra.mxu3 %vm351_vm4, %v1194_v1 }
 0xff0   :  { %v1136_v2 = vpop.f32.mrf.mxu2 }
 0xff8   :  { %v1138_v16 = vpop.f32.mrf.mxu2 }
0x1000   :  { %v1283_v5 = vpop.f32.mrf.mxu2 }
0x1001   :  { %v2018_v6 = vpack.i.bf16 %v1283_v5, %v1136_v2 }
0x1003   :  { %2019 = vrot.lane.b32.xlu2 %v2018_v6, %s2147_s27 }
0x1008   :  { %v1065_v47 = vpop.f32.mrf.mxu3  ;;  %v1285_v63 = vpop.f32.mrf.mxu2 }
0x1010   :  { %v1067_v7 = vpop.f32.mrf.mxu3 }
0x1018   :  { %v1212_v8 = vpop.f32.mrf.mxu3 }
0x1020   :  { %v1214_v9 = vpop.f32.mrf.mxu3 }
0x105d   :  { %v2020_v11 = vpop.permute.xlu2 %2019 }
0x105e   :  { %v2022_v58 = vunpack.i.h.bf16 %v2020_v11  ;;  %v2021_v12 = vunpack.i.l.bf16 %v2020_v11 }
0x1060   :  { %v1291_v29 = vsel %vm328_vm3, %v1212_v8, %v2022_v58  ;;  %v1144_v13 = vsel %vm328_vm3, %v1065_v47, %v2021_v12  ;;  %v2037_v47 = vld [vmem:[%s2740_s16 + $0x1] ss:$0 sm:$0xff] }
0x1061   :  { %v1297_v14 = vpack.c.bf16 %v1291_v29, %v1144_v13 }
0x1063   :  { %1900 = vmatmul.msk.bf16.vlgmr.msra.gmra.mxu0 %vm221_vm9, %v1297_v14 }
0x10e0   :  { %v1327_v46 = vpop.f32.mrf.mxu0 }
0x10e1   :  { %v1328_v51 = vadd.f32 %v2034_v15, %v1327_v46 }
0x10e3   :  { %v1332_v17 = vadd.f32 %v1328_v51, %v2523_v3 }
0x10e5   :  { %v1338_v18 = vsel %vm221_vm9, %v1332_v17, 0.0 }
0x10e6   :  { %1339 = vadd.xlane.f32.xlu0 %v1338_v18 }
0x10e8   :  { %v1329_v20 = vpop.f32.mrf.mxu0 }
0x10e9   :  { %v1330_v21 = vadd.f32 %v2034_v15, %v1329_v20 }
0x10eb   :  { %v1333_v22 = vadd.f32 %v1330_v21, %v2525_v4  ;;  %v1989_v4 = vld [vmem:[%s2739_s15 + $0x18] sm:$0xff] }
0x10ec   :  { %1424 = vmatpush.bf16.msra.mxu3 %v1989_v4 }
0x10ed   :  { %v1341_v56 = vsel %vm221_vm9, %v1333_v22, 0.0 }
0x10ee   :  { %1342 = vadd.xlane.f32.xlu2 %v1341_v56 }
0x10f0   :  { %1425 = vmatpush.bf16.msra.mxu3 %v1988_v36  ;;  %v1991_v36 = vld [vmem:[%s2741_s17 + $0x28] sm:$0xff] }
0x1159   :  { %v1340_v23 = vpop.xlane.xlu0 %1339 }
0x115a   :  { %v1344_v25 = vmul.f32 %v1340_v23, %v2329_v52 }
0x115c   :  { %v1346_v41 = vsub.f32 %v1332_v17, %v1344_v25 }
0x115e   :  { %v1348_v26 = vmul.f32 %v1346_v41, %v1346_v41 }
0x1160   :  { %v1350_v27 = vsel %vm221_vm9, %v1348_v26, 0.0 }
0x1161   :  { %v1343_v30 = vpop.xlane.xlu2 %1342  ;;  %1351 = vadd.xlane.f32.xlu1 %v1350_v27 }
0x1162   :  { %v1345_v3 = vmul.f32 %v1343_v30, %v2329_v52 }
0x1164   :  { %v1347_v42 = vsub.f32 %v1333_v22, %v1345_v3  ;;  %v1993_v22 = vld [vmem:[%s2741_s17 + $0x38] sm:$0xff]  ;;  %v1992_v3 = vld [vmem:[%s2741_s17 + $0x30] sm:$0xff] }
0x1165   :  { %1566 = vmatpush.bf16.msra.mxu1 %v1993_v22 }
0x1166   :  { %v1349_v31 = vmul.f32 %v1347_v42, %v1347_v42 }
0x1168   :  { %v1353_v32 = vsel %vm221_vm9, %v1349_v31, 0.0 }
0x1169   :  { %1354 = vadd.xlane.f32.xlu0 %v1353_v32  ;;  %1567 = vmatpush.bf16.msra.mxu1 %v1992_v3 }
0x116d   :  { %1568 = vmatpush.bf16.msra.mxu1 %v1991_v36 }
0x11d4   :  { %v1352_v33 = vpop.xlane.xlu1 %1351 }
0x11d5   :  { %v1356_v34 = vmul.f32 %v1352_v33, %v2329_v52 }
0x11d7   :  { %v1358_v35 = vadd.f32 1e-12, %v1356_v34 }
0x11d9   :  { %2093 = vrsqrt.f32 %v1358_v35  ;;  %vm1366_vm4 = vweird.f32 %v1358_v35 }
0x11dc   :  { %v1355_v40 = vpop.xlane.xlu0 %1354 }
0x11dd   :  { %v1357_v37 = vmul.f32 %v1355_v40, %v2329_v52 }
0x11df   :  { %v2094_v38 = vpop.eup %2093  ;;  %v1359_v39 = vadd.f32 1e-12, %v1357_v37 }
0x11e0   :  { %v1361_v43 = vmul.f32 %v2094_v38, %v1358_v35  ;;  %vm1367_vm3 = vweird.f32 %v2094_v38 }
0x11e1   :  { %2095 = vrsqrt.f32 %v1359_v39  ;;  %vm1368_vm5 = vmor %vm1366_vm4, %vm1367_vm3  ;;  %vm1376_vm15 = vweird.f32 %v1359_v39 }
0x11e2   :  { %v1362_v44 = vmul.f32 %v2094_v38, %v1361_v43 }
0x11e4   :  { %v1363_v45 = vmul.f32 0.5, %v1362_v44  ;;  %v1990_v44 = vld [vmem:[%s2741_s17 + $0x20] sm:$0xff] }
0x11e5   :  { %1569 = vmatpush.bf16.msra.mxu1 %v1990_v44 }
0x11e6   :  { %v1364_v24 = vsub.f32 1.5, %v1363_v45 }
0x11e7   :  { %v2096_v48 = vpop.eup %2095 }
0x11e8   :  { %v1365_v50 = vmul.f32 %v2094_v38, %v1364_v24  ;;  %v1371_v53 = vmul.f32 %v2096_v48, %v1359_v39  ;;  %vm1377_vm14 = vweird.f32 %v2096_v48 }
0x11e9   :  { %vm1378_vm0 = vmor %vm1376_vm15, %vm1377_vm14 }
0x11ea   :  { %v1372_v54 = vmul.f32 %v2096_v48, %v1371_v53  ;;  %v1369_v55 = vsel %vm1368_vm5, %v2094_v38, %v1365_v50 }
0x11eb   :  { %v1380_v49 = vmul.f32 %v1369_v55, %v1346_v41 }
0x11ec   :  { %v1373_v57 = vmul.f32 0.5, %v1372_v54 }
0x11ed   :  { %v1385_v1 = vmul.f32 %v2035_v60, %v1380_v49 }
0x11ee   :  { %v1374_v59 = vsub.f32 1.5, %v1373_v57 }
0x11ef   :  { %v2634_v5 = vadd.f32 %v2036_v61, %v1385_v1 }
0x11f0   :  { %v1375_v62 = vmul.f32 %v2096_v48, %v1374_v59 }
0x11f2   :  { %v1379_v0 = vsel %vm1378_vm0, %v2096_v48, %v1375_v62  ;;  %vm1639_vm0 = vcmask 1040384  }
0x11f3   :  { %v1381_v2 = vmul.f32 %v1379_v0, %v1347_v42 }
0x11f5   :  { %v1386_v16 = vmul.f32 %v2035_v60, %v1381_v2 }
0x11f7   :  { %v2636_v28 = vadd.f32 %v2036_v61, %v1386_v16 }
0x11f9   :  { %v1397_v6 = vpack.c.bf16 %v2636_v28, %v2634_v5 }
0x11fb   :  { %1916 = vmatmul.msk.bf16.vlgmr.msra.gmra.mxu3 %vm221_vm9, %v1397_v6 }
0x127e   :  { %v1427_v63 = vpop.f32.mrf.mxu3 }
0x127f   :  { %v2644_v7 = vadd.f32 %v2037_v47, %v1427_v63 }
0x1281   :  { %v2647_v8 = vmul.f32 0.70710677, %v2644_v7 }
0x1283   :  { %v1436_v9 = vmul.f32 %v2647_v8, %v2647_v8 }
0x1285   :  { %v1437_v10 = vmin.f32 %v1436_v9, 16.0 }
0x1286   :  { %v1429_v11 = vpop.f32.mrf.mxu3 }
0x1287   :  { %v1438_v58 = vmul.f32 2.1237322e-06, %v1437_v10  ;;  %v1449_v12 = vmul.f32 3.8918573e-05, %v1437_v10  ;;  %v2651_v29 = vadd.f32 %v2037_v47, %v1429_v11 }
0x1289   :  { %v1439_v13 = vadd.f32 0.00028619796, %v1438_v58  ;;  %v1450_v14 = vadd.f32 0.001143296, %v1449_v12  ;;  %v2654_v15 = vmul.f32 0.70710677, %v2651_v29 }
0x128b   :  { %v1451_v46 = vmul.f32 %v1450_v14, %v1437_v10  ;;  %v1476_v51 = vmul.f32 %v2654_v15, %v2654_v15  ;;  %v1440_v17 = vmul.f32 %v1439_v13, %v1437_v10 }
0x128d   :  { %v1452_v18 = vadd.f32 0.014752088, %v1451_v46  ;;  %v1477_v20 = vmin.f32 %v1476_v51, 16.0  ;;  %v1441_v25 = vadd.f32 0.0036580483, %v1440_v17 }
0x128f   :  { %v1453_v21 = vmul.f32 %v1452_v18, %v1437_v10  ;;  %v1478_v56 = vmul.f32 2.1237322e-06, %v1477_v20  ;;  %v1489_v23 = vmul.f32 3.8918573e-05, %v1477_v20  ;;  %v1442_v32 = vmul.f32 %v1441_v25, %v1437_v10 }
0x1291   :  { %v1454_v41 = vadd.f32 0.112945676, %v1453_v21  ;;  %v1479_v26 = vadd.f32 0.00028619796, %v1478_v56  ;;  %v1490_v27 = vadd.f32 0.001143296, %v1489_v23 }
0x1292   :  { %v1443_v37 = vadd.f32 0.05243302, %v1442_v32 }
0x1293   :  { %v1455_v30 = vmul.f32 %v1454_v41, %v1437_v10  ;;  %v1480_v42 = vmul.f32 %v1479_v26, %v1477_v20  ;;  %v1491_v31 = vmul.f32 %v1490_v27, %v1477_v20  ;;  %v1432_v27 = vmul.f32 0.5, %v2644_v7 }
0x1294   :  { %v1444_v24 = vmul.f32 %v1443_v37, %v1437_v10 }
0x1295   :  { %v1456_v4 = vadd.f32 0.4994258, %v1455_v30  ;;  %v1481_v33 = vadd.f32 0.0036580483, %v1480_v42  ;;  %v1492_v34 = vadd.f32 0.014752088, %v1491_v31 }
0x1296   :  { %v1445_v55 = vadd.f32 0.18741608, %v1444_v24  ;;  %v1433_v30 = vmul.f32 0.5, %v2651_v29 }
0x1297   :  { %v1457_v35 = vmul.f32 %v1456_v4, %v1437_v10  ;;  %v1493_v40 = vmul.f32 %v1492_v34, %v1477_v20  ;;  %v1482_v39 = vmul.f32 %v1481_v33, %v1477_v20 }
0x1298   :  { %v1446_v62 = vmul.f32 %v1445_v55, %v1437_v10  ;;  %v1995_v55 = vld [vmem:[%s2745_s21 + $0x8] sm:$0xff] }
0x1299   :  { %v1458_v38 = vadd.f32 1.0, %v1457_v35  ;;  %v1494_v43 = vadd.f32 0.112945676, %v1493_v40  ;;  %v1483_v48 = vadd.f32 0.05243302, %v1482_v39  ;;  %1671 = vmatpush.bf16.msra.mxu2 %v1995_v55 }
0x129a   :  { %v1447_v6 = vadd.f32 1.1283791, %v1446_v62 }
0x129b   :  { %2097 = vrcp.f32 %v1458_v38  ;;  %v1495_v45 = vmul.f32 %v1494_v43, %v1477_v20  ;;  %v1484_v59 = vmul.f32 %v1483_v48, %v1477_v20  ;;  %v1470_v61 = vand.u32 2147483648, %v1458_v38 }
0x129c   :  { %v1468_v2 = vand.u32 2147483647, %v1458_v38  ;;  %vm1464_vm2 = vweird.f32 %v1458_v38  ;;  %v1448_v13 = vmul.f32 %v1447_v6, %v2647_v8 }
0x129d   :  { %v1496_v50 = vadd.f32 0.4994258, %v1495_v45  ;;  %v1485_v1 = vadd.f32 0.18741608, %v1484_v59  ;;  %v1471_v9 = vor.u32 1.1754944e-38, %v1470_v61  ;;  %v1994_v59 = vld [vmem:[%s2745_s21] sm:$0xff] }
0x129e   :  { %vm1469_vm7 = vcmp.eq.f32.partialorder %v1468_v2, 8.507059e+37  ;;  %1672 = vmatpush.bf16.msra.mxu2 %v1994_v59 }
0x129f   :  { %v1497_v53 = vmul.f32 %v1496_v50, %v1477_v20  ;;  %v1486_v11 = vmul.f32 %v1485_v1, %v1477_v20 }
0x12a1   :  { %v2098_v54 = vpop.eup %2097  ;;  %v1498_v60 = vadd.f32 1.0, %v1497_v53  ;;  %v1487_v10 = vadd.f32 1.1283791, %v1486_v11 }
0x12a2   :  { %v1460_v57 = vmul.f32 %v2098_v54, %v1458_v38  ;;  %vm1465_vm1 = vweird.f32 %v2098_v54 }
0x12a3   :  { %2099 = vrcp.f32 %v1498_v60  ;;  %vm1466_vm6 = vmor %vm1464_vm2, %vm1465_vm1  ;;  %v1510_v46 = vand.u32 2147483648, %v1498_v60  ;;  %v1508_v18 = vand.u32 2147483647, %v1498_v60  ;;  %vm1504_vm10 = vweird.f32 %v1498_v60 }
0x12a4   :  { %v1461_v49 = vsub.f32 1.0, %v1460_v57  ;;  %v1488_v23 = vmul.f32 %v1487_v10, %v2654_v15  ;;  %v2038_v15 = vld [vmem:[%s2742_s18 + $0x1] ss:$0 sm:$0xff]  ;;  %vm1723_vm1 = vcmask 9216   ;;  %vm1741_vm2 = vcmask 1041408  }
0x12a5   :  { %v1511_v22 = vor.u32 1.1754944e-38, %v1510_v46  ;;  %vm1509_vm12 = vcmp.eq.f32.partialorder %v1508_v18, 8.507059e+37 }
0x12a6   :  { %v1462_v0 = vmul.f32 %v2098_v54, %v1461_v49 }
0x12a8   :  { %v1463_v16 = vadd.f32 %v2098_v54, %v1462_v0 }
0x12a9   :  { %v2100_v47 = vpop.eup %2099 }
0x12aa   :  { %v1467_v63 = vsel %vm1466_vm6, %v2098_v54, %v1463_v16  ;;  %v1500_v58 = vmul.f32 %v2100_v47, %v1498_v60  ;;  %vm1505_vm8 = vweird.f32 %v2100_v47 }
0x12ab   :  { %v1472_v12 = vsel %vm1469_vm7, %v1471_v9, %v1467_v63  ;;  %vm1506_vm11 = vmor %vm1504_vm10, %vm1505_vm8  ;;  %vm1757_vm7 = vcmask 0  }
0x12ac   :  { %v1501_v14 = vsub.f32 1.0, %v1500_v58  ;;  %v1473_v51 = vmul.f32 %v1472_v12, %v1448_v13 }
0x12ae   :  { %v1502_v17 = vmul.f32 %v2100_v47, %v1501_v14  ;;  %v1917_v56 = vclamps-f32 %v1473_v51, 1.0  ;;  %v2040_v51 = vld [vmem:[%s2775_s29 + $0x1] ss:$0 sm:$0xff] }
0x12b0   :  { %v1503_v21 = vadd.f32 %v2100_v47, %v1502_v17  ;;  %v1516_v26 = vadd.f32 1.0, %v1917_v56 }
0x12b2   :  { %v1507_v20 = vsel %vm1506_vm11, %v2100_v47, %v1503_v21  ;;  %v1518_v42 = vmul.f32 %v1516_v26, %v1432_v27  ;;  %v2041_v26 = vld [vmem:[%s2746_s22] ss:$0 sm:$0xff]  ;;  %s2150_s22 = smov [#allocation2]  }
0x12b3   :  { %v1512_v25 = vsel %vm1509_vm12, %v1511_v22, %v1507_v20 }
0x12b4   :  { %v1513_v41 = vmul.f32 %v1512_v25, %v1488_v23  ;;  %v1997_v25 = vld [vmem:[%s2747_s23 + $0x8] sm:$0xff] }
0x12b5   :  { %1709 = vmatpush.bf16.msrb.mxu0 %v1997_v25 }
0x12b6   :  { %v1918_v8 = vclamps-f32 %v1513_v41, 1.0  ;;  %v1996_v41 = vld [vmem:[%s2747_s23] sm:$0xff]  ;;  %s1764_s23 = sshll.u32 %s2150_s22, 4  ;;  %s1765_s23 = int_to_ptr.vmem [resolvable:$true] %s1764_s23 }
0x12b8   :  { %v1517_v3 = vadd.f32 1.0, %v1918_v8 }
0x12b9   :  { %1710 = vmatpush.bf16.msrb.mxu0 %v1996_v41 }
0x12ba   :  { %v1519_v31 = vmul.f32 %v1517_v3, %v1433_v30 }
0x12bc   :  { %v1529_v32 = vpack.c.bf16 %v1519_v31, %v1518_v42  ;;  %v2042_v31 = vld [vmem:[%s2748_s24] ss:$0 sm:$0xff] }
0x12be   :  { %1944 = vmatmul.msk.bf16.vlgmr.msra.gmra.mxu1 %vm882_vm13, %v1529_v32 }
0x133b   :  { %v1571_v4 = vpop.f32.mrf.mxu1 }
0x133c   :  { %v1572_v33 = vadd.f32 %v2038_v15, %v1571_v4 }
0x133e   :  { %v1576_v34 = vadd.f32 %v1572_v33, %v2634_v5 }
0x1340   :  { %v1582_v35 = vsel %vm221_vm9, %v1576_v34, 0.0 }
0x1341   :  { %1583 = vadd.xlane.f32.xlu0 %v1582_v35 }
0x1343   :  { %v1573_v7 = vpop.f32.mrf.mxu1 }
0x1344   :  { %v1574_v36 = vadd.f32 %v2038_v15, %v1573_v7 }
0x1346   :  { %v1577_v29 = vadd.f32 %v1574_v36, %v2636_v28  ;;  %v1716_v28 = vld [vmem:[%s2776_s3] sm:$0x3] }
0x1348   :  { %v1585_v40 = vsel %vm221_vm9, %v1577_v29, 0.0 }
0x1349   :  { %1586 = vadd.xlane.f32.xlu2 %v1585_v40 }
0x13b4   :  { %v1584_v37 = vpop.xlane.xlu0 %1583 }
0x13b5   :  { %v1588_v38 = vmul.f32 %v1584_v37, %v2329_v52 }
0x13b7   :  { %v1590_v39 = vsub.f32 %v1576_v34, %v1588_v38 }
0x13b9   :  { %v1592_v43 = vmul.f32 %v1590_v39, %v1590_v39 }
0x13bb   :  { %v1594_v44 = vsel %vm221_vm9, %v1592_v43, 0.0 }
0x13bc   :  { %v1587_v45 = vpop.xlane.xlu2 %1586  ;;  %1595 = vadd.xlane.f32.xlu0 %v1594_v44  ;;  %v2148_v44 = vmov 0.0  }
0x13bd   :  { %v1589_v5 = vmul.f32 %v1587_v45, %v2329_v52 }
0x13bf   :  { %v1591_v24 = vsub.f32 %v1577_v29, %v1589_v5 }
0x13c1   :  { %v1593_v48 = vmul.f32 %v1591_v24, %v1591_v24 }
0x13c3   :  { %v1597_v50 = vsel %vm221_vm9, %v1593_v48, 0.0  ;;  %v2149_v48 = vmov 2.0  }
0x13c4   :  { %1598 = vadd.xlane.f32.xlu2 %v1597_v50 }
0x13d0   :  { %1718 = vperm.xlu0 %2010, %v1716_v28  }
0x142f   :  { %v1596_v53 = vpop.xlane.xlu0 %1595 }
0x1430   :  { %v1600_v54 = vmul.f32 %v1596_v53, %v2329_v52 }
0x1432   :  { %v1602_v57 = vadd.f32 1e-12, %v1600_v54 }
0x1434   :  { %2101 = vrsqrt.f32 %v1602_v57  ;;  %vm1610_vm3 = vweird.f32 %v1602_v57 }
0x1437   :  { %v1599_v60 = vpop.xlane.xlu2 %1598 }
0x1438   :  { %v1601_v49 = vmul.f32 %v1599_v60, %v2329_v52  ;;  %v2039_v52 = vld [vmem:[%s2743_s19 + $0x1] ss:$0 sm:$0xff] }
0x143a   :  { %v2102_v62 = vpop.eup %2101  ;;  %v1603_v0 = vadd.f32 1e-12, %v1601_v49 }
0x143b   :  { %v1605_v61 = vmul.f32 %v2102_v62, %v1602_v57  ;;  %vm1611_vm13 = vweird.f32 %v2102_v62 }
0x143c   :  { %2103 = vrsqrt.f32 %v1603_v0  ;;  %vm1612_vm4 = vmor %vm1610_vm3, %vm1611_vm13  ;;  %vm1620_vm14 = vweird.f32 %v1603_v0 }
0x143d   :  { %v1606_v1 = vmul.f32 %v2102_v62, %v1605_v61 }
0x143f   :  { %v1607_v2 = vmul.f32 0.5, %v1606_v1 }
0x1441   :  { %v1608_v16 = vsub.f32 1.5, %v1607_v2 }
0x1442   :  { %v2104_v6 = vpop.eup %2103  ;;  %v1719_v37 = vpop.permute.xlu0 %1718 }
0x1443   :  { %v1615_v47 = vmul.f32 %v2104_v6, %v1603_v0  ;;  %v1609_v63 = vmul.f32 %v2102_v62, %v1608_v16  ;;  %vm1621_vm5 = vweird.f32 %v2104_v6 }
0x1444   :  { %vm1622_vm15 = vmor %vm1620_vm14, %vm1621_vm5 }
0x1445   :  { %v1616_v9 = vmul.f32 %v2104_v6, %v1615_v47  ;;  %v1613_v58 = vsel %vm1612_vm4, %v2102_v62, %v1609_v63 }
0x1446   :  { %v1624_v14 = vmul.f32 %v1613_v58, %v1590_v39 }
0x1447   :  { %v1617_v11 = vmul.f32 0.5, %v1616_v9 }
0x1448   :  { %v1629_v17 = vmul.f32 %v2039_v52, %v1624_v14 }
0x1449   :  { %v1618_v12 = vsub.f32 1.5, %v1617_v11 }
0x144a   :  { %v1634_v22 = vadd.f32 %v2040_v51, %v1629_v17 }
0x144b   :  { %v1619_v13 = vmul.f32 %v2104_v6, %v1618_v12 }
0x144d   :  { %v1623_v10 = vsel %vm1622_vm15, %v2104_v6, %v1619_v13 }
0x144e   :  { %v1625_v46 = vmul.f32 %v1623_v10, %v1591_v24 }
0x1450   :  { %v1630_v18 = vmul.f32 %v2039_v52, %v1625_v46 }
0x1452   :  { %v1635_v21 = vadd.f32 %v2040_v51, %v1630_v18 }
0x1454   :  { %v1637_v56 = vrot.slane %v1635_v21, 7 }
0x1456   :  { %v1640_v23 = vsel %vm1639_vm0, %v1634_v22, %v1637_v56 }
0x1457   :  { %v1645_v20 = vpack.c.bf16 %v1640_v23, %v1640_v23 }
0x1459   :  { %1955 = vmatmul.msk.bf16.vlgmr.msra.gmra.mxu2 %vm221_vm9, %v1645_v20 }
0x14dc   :  { %v1674_v8 = vpop.f32.mrf.mxu2 }
0x14dd   :  { %v1675_v27 = vadd.f32 %v2041_v26, %v1674_v8 }
0x14df   :  { %2105 = vtanh.f32 %v1675_v27 }
0x14e4   :  { %v1676_v30 = vpop.f32.mrf.mxu2 }
0x14e5   :  { %v2106_v3 = vpop.eup %2105 }
0x14e6   :  { %v1683_v42 = vpack.c.bf16 %v2106_v3, %v2106_v3 }
0x14e8   :  { %1964 = vmatmul.msk.bf16.vlgmr.msrb.gmra.mxu0 %vm221_vm9, %v1683_v42  ;;  %vm1720_vm9 = vcmp.eq.s32.totalorder %v1719_v37, %v2317_v19 }
0x14e9   :  { %v1965_v45 = vsel %vm1720_vm9, 1.0, %v2148_v44 }
0x1565   :  { %v1712_v32 = vpop.f32.mrf.mxu0 }
0x1566   :  { %v1713_v15 = vadd.f32 %v2042_v31, %v1712_v32 }
0x1568   :  { %v1724_v4 = vsel %vm1723_vm1, %v1713_v15, -inf }
0x1569   :  { %1725 = vmax.xlane.f32.xlu2 %v1724_v4 }
0x156d   :  { %v1714_v33 = vpop.f32.mrf.mxu0 }
0x15dc   :  { %v1726_v34 = vpop.xlane.xlu2 %1725 }
0x15dd   :  { %v1727_v35 = vsub.f32 %v1713_v15, %v1726_v34 }
0x15df   :  { %v1728_v7 = vmul.f32 1.442695, %v1727_v35 }
0x15e1   :  { %2107 = vpow2.f32 %v1728_v7 }
0x15e7   :  { %v2108_v36 = vpop.eup %2107 }
0x15e8   :  { %v1730_v29 = vsel %vm1723_vm1, %v2108_v36, 0.0 }
0x15e9   :  { %1731 = vadd.xlane.f32.xlu1 %v1730_v29 }
0x165c   :  { %v1732_v40 = vpop.xlane.xlu1 %1731 }
0x165d   :  { %2109 = vlog2.f32 %v1732_v40 }
0x165e   :  { %2111 = vrcp.f32 %v2149_v48 }
0x1663   :  { %v2110_v38 = vpop.eup %2109 }
0x1664   :  { %v1734_v39 = vmul.f32 0.6931472, %v2110_v38  ;;  %v2112_v50 = vpop.eup %2111 }
0x1665   :  { %v1750_v28 = vmul.f32 2.0, %v2112_v50  ;;  %vm1754_vm6 = vweird.f32 %v2112_v50 }
0x1666   :  { %v1735_v43 = vsub.f32 %v1727_v35, %v1734_v39 }
0x1667   :  { %v1751_v55 = vsub.f32 1.0, %v1750_v28 }
0x1668   :  { %v1736_v5 = vmul.f32 %v1965_v45, %v1735_v43 }
0x1669   :  { %v1752_v60 = vmul.f32 %v2112_v50, %v1751_v55 }
0x166a   :  { %v1737_v24 = vsel %vm1723_vm1, %v1736_v5, 0.0 }
0x166b   :  { %1738 = vadd.xlane.f32.xlu2 %v1737_v24  ;;  %v1753_v62 = vadd.f32 %v2112_v50, %v1752_v60 }
0x166d   :  { %v1755_v1 = vsel %vm1754_vm6, %v2112_v50, %v1753_v62 }
0x16de   :  { %v1739_v53 = vpop.xlane.xlu2 %1738 }
0x16df   :  { %v1740_v54 = vsub.f32 0.0, %v1739_v53 }
0x16e1   :  { %v1742_v57 = vsel %vm1741_vm2, %v1740_v54, 0.0 }
0x16e2   :  { %v1743_v59 = vrot.slane %v1742_v57, 4 }
0x16e4   :  { %v1744_v19 = vadd.f32 %v1743_v59, %v1742_v57 }
0x16e6   :  { %v1745_v49 = vrot.slane %v1744_v19, 2 }
0x16e8   :  { %v1746_v0 = vadd.f32 %v1745_v49, %v1744_v19 }
0x16ea   :  { %v1747_v61 = vrot.slane %v1746_v0, 1 }
0x16ec   :  { %v1748_v2 = vadd.f32 %v1747_v61, %v1746_v0 }
0x16ee   :  { %v1756_v16 = vmul.f32 %v1755_v1, %v1748_v2 }
0x16f0   :  { %1758 = vst.msk [vmem:[#allocation2] sm:$0x1] %vm1757_vm7, %v1756_v16 }
0x16f1   :  { %1769 = dma.vmem_to_hbm [thread:$0]  %s1765_s23, 16, %s1767_s9, [#allocation3]  }
0x16f2   :  { %2137 = dma.done.wait [#allocation3], 16  }
0x16f3   :  { %2138 = vsyncadd [#allocation3], 4294967280 }
0x16f4   :  { %1774 = vsyncpa [#allocation3], 1 }

</bundles_post_ra>
